<compile_context>
chip_gen: v6e
topology: v6e:2x2x1
jax: 0.10.0
libtpu: 0.0.40
codegen_flags: <defaults>
</compile_context>

<pallas_src>
import functools

import jax
import jax.numpy as jnp
from jax.experimental import pallas as pl
from jax.experimental.pallas import tpu as pltpu


def _dwconv_kernel(x_ref, w_ref, b_ref, o_ref, xp_ref, *,
                   KH, KW, dh, dw, pad_t, pad_l, H, W, OH, OW, Ct, activation):
    # x_ref : (Ct, H, W)        VMEM input tile (one batch elem, Ct channels)
    # w_ref : (C*KH*KW,)        f32 filter taps in SMEM (per-channel scalars)
    # b_ref : (C,)              f32 bias in SMEM
    # o_ref : (Ct, OH, OW)      output tile (OH/OW = stride-1 output extents)
    # xp_ref: (Ct, Hp, Wp)      VMEM scratch, zero-padded copy of the tile
    Hp = OH + (KH - 1) * dh
    Wp = OW + (KW - 1) * dw
    pad_b = Hp - H - pad_t
    pad_r = Wp - W - pad_l
    xdt = xp_ref.dtype

    # ---- in-kernel zero padding (no wrapper jnp.pad HBM pass) ----
    # Zero only the halo border, then place the tile in the interior.
    if pad_t or pad_b or pad_l or pad_r:
        if pad_t:
            xp_ref[:, :pad_t, :] = jnp.zeros((Ct, pad_t, Wp), xdt)
        if pad_b:
            xp_ref[:, pad_t + H:, :] = jnp.zeros((Ct, pad_b, Wp), xdt)
        if pad_l:
            xp_ref[:, pad_t:pad_t + H, :pad_l] = jnp.zeros((Ct, H, pad_l), xdt)
        if pad_r:
            xp_ref[:, pad_t:pad_t + H, pad_l + W:] = jnp.zeros((Ct, H, pad_r), xdt)
        xp_ref[:, pad_t:pad_t + H, pad_l:pad_l + W] = x_ref[...]
        src = xp_ref
    else:
        src = x_ref          # padding='valid': read the input tile directly

    c_base = pl.program_id(1) * Ct          # absolute channel offset of this tile
    taps = KH * KW

    for c in range(Ct):                     # static unroll over channels in tile
        acc = jnp.full((OH, OW), b_ref[c_base + c], jnp.float32)
        # Hoist the lane (W) shift out of the KH loop: KW shifts, not KH*KW.
        for j in range(KW):
            xw = src[c, :, j * dw:j * dw + OW]            # (Hp, OW)
            for i in range(KH):
                w_s = w_ref[(c_base + c) * taps + i * KW + j].astype(xdt)
                # multiply in input dtype (bf16 on v6e/v7x), accumulate in f32
                acc = acc + (xw[i * dh:i * dh + OH, :] * w_s).astype(jnp.float32)
        if activation == "relu":
            acc = jnp.maximum(acc, 0.0)
        elif activation == "relu6":
            acc = jnp.clip(acc, 0.0, 6.0)
        o_ref[c] = acc.astype(o_ref.dtype)


def _pick_channel_tile(C, H, W, esize, *, budget_bytes=2 << 20, max_unroll=16):
    """Largest divisor of C whose per-block footprint fits the budget.

    Budget is per single x-block; with double-buffered in/out blocks plus the
    padded scratch, peak VMEM is ~5x this, comfortably inside the 32 MiB scoped
    limit (and v7x's 64 MiB physical VMEM).
    """
    per_ch = max(H * W * esize, 1)
    ct = 1
    for d in range(1, C + 1):
        if C % d == 0 and d <= max_unroll and d * per_ch <= budget_bytes:
            ct = d
    return ct


def depthwise_conv2d(x, weight, bias=None, *, kernel_size, strides=(1, 1),
                     padding="same", dilation=(1, 1), activation=None,
                     channel_tile=None):
    """PyTorch-semantics depthwise conv, NCHW in/out.

    Supports the module's three paths:
      * strides (1,1), padding 'same'  : torch 'same' (left/top gets total//2)
      * strides (2,2), padding 'same'  : module rewrites to ZeroPad2d([0,1,0,1])
                                         + 'valid' conv with stride 2
      * strides (1,1), padding 'valid'
    x: (N, C, H, W); weight: (C, 1, KH, KW) (torch layout); bias: (C,) or None.
    """
    N, C, H, W = x.shape
    if isinstance(kernel_size, int):
        kernel_size = (kernel_size, kernel_size)
    KH, KW = kernel_size
    if isinstance(strides, int):
        strides = (strides, strides)
    if isinstance(dilation, int):
        dilation = (dilation, dilation)
    strides = tuple(strides)
    dilation = tuple(dilation)
    if activation not in (None, "relu", "relu6"):
        raise ValueError(f"unsupported activation: {activation}")

    dh, dw = dilation
    if strides == (1, 1) and padding == "same":
        ph, pw = dh * (KH - 1), dw * (KW - 1)
        pad_t, pad_l = ph // 2, pw // 2         # torch 'same': left/top gets total//2
        Hp, Wp = H + ph, W + pw
        sh, sw = 1, 1
    elif strides == (2, 2) and padding == "same":
        # Module path: ZeroPad2d([0,1,0,1]) then 'valid' conv, stride 2.
        pad_t, pad_l = 0, 0
        Hp, Wp = H + 1, W + 1
        sh, sw = 2, 2
    elif strides == (1, 1) and padding == "valid":
        pad_t, pad_l = 0, 0
        Hp, Wp = H, W
        sh, sw = 1, 1
    else:
        raise NotImplementedError(
            f"depthwise_conv2d: unsupported strides={strides}, padding={padding}")

    OH = Hp - dh * (KH - 1)          # stride-1 output extents over the padded tile
    OW = Wp - dw * (KW - 1)
    assert OH > 0 and OW > 0, "kernel larger than (padded) input"

    # Filter taps / bias as flat f32 scalar tables for SMEM (1-D to avoid SMEM
    # 2-D padding blowup).
    w_flat = jnp.asarray(weight, jnp.float32).reshape(C * KH * KW)
    b_vec = (jnp.zeros((C,), jnp.float32) if bias is None
             else jnp.asarray(bias, jnp.float32).reshape(C))

    esize = jnp.dtype(x.dtype).itemsize
    Ct = channel_tile if channel_tile is not None else _pick_channel_tile(C, H, W, esize)
    assert C % Ct == 0, "channel tile must divide C"

    kernel = functools.partial(
        _dwconv_kernel, KH=KH, KW=KW, dh=dh, dw=dw, pad_t=pad_t, pad_l=pad_l,
        H=H, W=W, OH=OH, OW=OW, Ct=Ct, activation=activation)

    out_full = pl.pallas_call(
        kernel,
        out_shape=jax.ShapeDtypeStruct((N, C, OH, OW), x.dtype),
        grid_spec=pltpu.PrefetchScalarGridSpec(
            num_scalar_prefetch=0,
            grid=(N, C // Ct),
            in_specs=[
                pl.BlockSpec((None, Ct, H, W), lambda n, c: (n, c, 0, 0)),
                pl.BlockSpec(memory_space=pltpu.MemorySpace.SMEM),   # filter taps
                pl.BlockSpec(memory_space=pltpu.MemorySpace.SMEM),   # bias
            ],
            out_specs=pl.BlockSpec((None, Ct, OH, OW), lambda n, c: (n, c, 0, 0)),
            scratch_shapes=[pltpu.VMEM((Ct, Hp, Wp), x.dtype)],
        ),
        compiler_params=pltpu.CompilerParams(
            dimension_semantics=("parallel", "parallel"),
            vmem_limit_bytes=32 * 1024 * 1024),
    )(x, w_flat, b_vec)

    if (sh, sw) == (1, 1):
        return out_full
    # TODO(synk): decimate inside the kernel instead of this extra XLA pass.
    return out_full[:, :, ::sh, ::sw]


def _reference(x_nchw, weight, bias, *, strides=(1, 1), dilation=(1, 1),
               activation=None):
    C = x_nchw.shape[1]
    if strides == (2, 2):
        # Module path: ZeroPad2d([0,1,0,1]) then 'valid' conv stride 2.
        x_nchw = jnp.pad(x_nchw, ((0, 0), (0, 0), (0, 1), (0, 1)))
        pad = "VALID"
    else:
        pad = "SAME"
    y = jax.lax.conv_general_dilated(
        x_nchw, weight, window_strides=strides, padding=pad,
        rhs_dilation=dilation,
        dimension_numbers=("NCHW", "OIHW", "NCHW"),
        feature_group_count=C)
    if bias is not None:
        y = y + bias.reshape(1, C, 1, 1)
    if activation == "relu":
        y = jnp.maximum(y, 0.0)
    elif activation == "relu6":
        y = jnp.clip(y, 0.0, 6.0)
    return y


if __name__ == "__main__":
    # Module config: DepthwiseConv2D(in_channels=4, kernel_size=3, strides=(1,1),
    #                                padding='same', use_bias=True, activation='relu')
    N, C, H, W = 2, 4, 16, 16
    KH, KW = 3, 3

    key = jax.random.PRNGKey(0)
    kx, kw, kb = jax.random.split(key, 3)
    x = jax.random.normal(kx, (N, C, H, W), jnp.float32)
    weight = jax.random.normal(kw, (C, 1, KH, KW), jnp.float32) * 0.1   # torch layout
    bias = jax.random.normal(kb, (C,), jnp.float32) * 0.1

    # Config 1: 3x3, stride 1, 'same', bias, relu.
    y = depthwise_conv2d(x, weight, bias, kernel_size=(KH, KW), activation="relu")
    y = jax.block_until_ready(y)
    y_ref = _reference(x, weight, bias, dilation=(1, 1), activation="relu")
    assert y.shape == (N, C, H, W)
    assert jnp.allclose(y, y_ref, atol=1e-5, rtol=1e-5), "mismatch vs reference (cfg 1)"

    # Config 2: dilation (2, 2), no bias, relu6.
    y2 = depthwise_conv2d(x, weight, None, kernel_size=(KH, KW),
                          dilation=(2, 2), activation="relu6")
    y2 = jax.block_until_ready(y2)
    y2_ref = _reference(x, weight, None, dilation=(2, 2), activation="relu6")
    assert jnp.allclose(y2, y2_ref, atol=1e-5, rtol=1e-5), "mismatch vs reference (cfg 2)"

    # Config 3: stride (2, 2) -> module rewrites to 'valid' + ZeroPad2d([0,1,0,1]).
    y3 = depthwise_conv2d(x, weight, bias, kernel_size=(KH, KW),
                          strides=(2, 2), activation="relu")
    y3 = jax.block_until_ready(y3)
    y3_ref = _reference(x, weight, bias, strides=(2, 2), activation="relu")
    assert y3.shape == y3_ref.shape == (N, C, 8, 8)
    assert jnp.allclose(y3, y3_ref, atol=1e-5, rtol=1e-5), "mismatch vs reference (cfg 3)"

    print("KERNEL_OK")
</pallas_src>

<mosaic_0001>
module attributes {stable_mosaic.version = 11 : i64} {
  func.func @_dwconv_kernel(%arg0: i32, %arg1: i32, %arg2: memref<1x4x16x16xf32, #tpu.memory_space<vmem>>, %arg3: memref<36xf32, #tpu.memory_space<smem>>, %arg4: memref<4xf32, #tpu.memory_space<smem>>, %arg5: memref<1x4x16x16xf32, #tpu.memory_space<vmem>>, %arg6: memref<4x18x18xf32, #tpu.memory_space<vmem>>) attributes {dimension_semantics = [#tpu.dimension_semantics<parallel>, #tpu.dimension_semantics<parallel>], iteration_bounds = array<i64: 2, 1>, scalar_prefetch = 0 : i64, scratch_operands = 1 : i64, tpu.core_type = #tpu.core_type<tc>, window_params = [{transform_indices = @transform_0, window_bounds = array<i64: 1, 4, 16, 16>}, {transform_indices = @transform_1, window_bounds = array<i64: 36>}, {transform_indices = @transform_2, window_bounds = array<i64: 4>}, {transform_indices = @transform_3, window_bounds = array<i64: 1, 4, 16, 16>}]} {
    %cst = arith.constant 0.000000e+00 : f32
    %0 = vector.broadcast %cst : f32 to vector<4x1x18xf32>
    %c0 = arith.constant 0 : index
    %c0_0 = arith.constant 0 : index
    %c0_1 = arith.constant 0 : index
    %1 = vector.load %arg6[%c0, %c0_0, %c0_1] : memref<4x18x18xf32, #tpu.memory_space<vmem>>, vector<4x1x18xf32>
    tpu.vector_store %arg6[%c0, %c0_0, %c0_1], %0 {strides = array<i32>} : memref<4x18x18xf32, #tpu.memory_space<vmem>>, vector<4x1x18xf32>,
    %cst_2 = arith.constant 0.000000e+00 : f32
    %2 = vector.broadcast %cst_2 : f32 to vector<4x1x18xf32>
    %c0_3 = arith.constant 0 : index
    %c17 = arith.constant 17 : index
    %c0_4 = arith.constant 0 : index
    %3 = vector.load %arg6[%c0_3, %c17, %c0_4] : memref<4x18x18xf32, #tpu.memory_space<vmem>>, vector<4x1x18xf32>
    tpu.vector_store %arg6[%c0_3, %c17, %c0_4], %2 {strides = array<i32>} : memref<4x18x18xf32, #tpu.memory_space<vmem>>, vector<4x1x18xf32>,
    %cst_5 = arith.constant 0.000000e+00 : f32
    %4 = vector.broadcast %cst_5 : f32 to vector<4x16x1xf32>
    %c0_6 = arith.constant 0 : index
    %c1 = arith.constant 1 : index
    %c0_7 = arith.constant 0 : index
    %5 = vector.load %arg6[%c0_6, %c1, %c0_7] : memref<4x18x18xf32, #tpu.memory_space<vmem>>, vector<4x16x1xf32>
    tpu.vector_store %arg6[%c0_6, %c1, %c0_7], %4 {strides = array<i32>} : memref<4x18x18xf32, #tpu.memory_space<vmem>>, vector<4x16x1xf32>,
    %cst_8 = arith.constant 0.000000e+00 : f32
    %6 = vector.broadcast %cst_8 : f32 to vector<4x16x1xf32>
    %c0_9 = arith.constant 0 : index
    %c1_10 = arith.constant 1 : index
    %c17_11 = arith.constant 17 : index
    %7 = vector.load %arg6[%c0_9, %c1_10, %c17_11] : memref<4x18x18xf32, #tpu.memory_space<vmem>>, vector<4x16x1xf32>
    tpu.vector_store %arg6[%c0_9, %c1_10, %c17_11], %6 {strides = array<i32>} : memref<4x18x18xf32, #tpu.memory_space<vmem>>, vector<4x16x1xf32>,
    %c0_12 = arith.constant 0 : index
    %c0_13 = arith.constant 0 : index
    %c0_14 = arith.constant 0 : index
    %c0_15 = arith.constant 0 : index
    %8 = vector.load %arg2[%c0_12, %c0_13, %c0_14, %c0_15] : memref<1x4x16x16xf32, #tpu.memory_space<vmem>>, vector<1x4x16x16xf32>
    %9 = vector.shape_cast %8 : vector<1x4x16x16xf32> to vector<4x16x16xf32>
    %c0_16 = arith.constant 0 : index
    %c1_17 = arith.constant 1 : index
    %c1_18 = arith.constant 1 : index
    %10 = vector.load %arg6[%c0_16, %c1_17, %c1_18] : memref<4x18x18xf32, #tpu.memory_space<vmem>>, vector<4x16x16xf32>
    tpu.vector_store %arg6[%c0_16, %c1_17, %c1_18], %9 {strides = array<i32>} : memref<4x18x18xf32, #tpu.memory_space<vmem>>, vector<4x16x16xf32>,
    %c4_i32 = arith.constant 4 : i32
    %11 = arith.muli %arg1, %c4_i32 : i32
    %c0_i32 = arith.constant 0 : i32
    %12 = arith.addi %11, %c0_i32 : i32
    %13 = arith.index_cast %12 : i32 to index
    %14 = memref.load %arg4[%13] : memref<4xf32, #tpu.memory_space<smem>>
    %15 = vector.broadcast %14 : f32 to vector<16x16xf32>
    %c0_19 = arith.constant 0 : index
    %c0_20 = arith.constant 0 : index
    %c0_21 = arith.constant 0 : index
    %16 = vector.load %arg6[%c0_19, %c0_20, %c0_21] : memref<4x18x18xf32, #tpu.memory_space<vmem>>, vector<1x18x16xf32>
    %17 = vector.shape_cast %16 : vector<1x18x16xf32> to vector<18x16xf32>
    %c0_i32_22 = arith.constant 0 : i32
    %18 = arith.addi %11, %c0_i32_22 : i32
    %c9_i32 = arith.constant 9 : i32
    %19 = arith.muli %18, %c9_i32 : i32
    %c0_i32_23 = arith.constant 0 : i32
    %20 = arith.addi %19, %c0_i32_23 : i32
    %c0_i32_24 = arith.constant 0 : i32
    %21 = arith.addi %20, %c0_i32_24 : i32
    %22 = arith.index_cast %21 : i32 to index
    %23 = memref.load %arg3[%22] : memref<36xf32, #tpu.memory_space<smem>>
    %24 = vector.extract_strided_slice %17 {offsets = [0, 0], sizes = [16, 16], strides = [1, 1]} : vector<18x16xf32> to vector<16x16xf32>
    %25 = vector.broadcast %23 : f32 to vector<16x16xf32>
    %26 = arith.mulf %24, %25 : vector<16x16xf32>
    %27 = arith.addf %15, %26 : vector<16x16xf32>
    %c0_i32_25 = arith.constant 0 : i32
    %28 = arith.addi %11, %c0_i32_25 : i32
    %c9_i32_26 = arith.constant 9 : i32
    %29 = arith.muli %28, %c9_i32_26 : i32
    %c3_i32 = arith.constant 3 : i32
    %30 = arith.addi %29, %c3_i32 : i32
    %c0_i32_27 = arith.constant 0 : i32
    %31 = arith.addi %30, %c0_i32_27 : i32
    %32 = arith.index_cast %31 : i32 to index
    %33 = memref.load %arg3[%32] : memref<36xf32, #tpu.memory_space<smem>>
    %34 = vector.extract_strided_slice %17 {offsets = [1, 0], sizes = [16, 16], strides = [1, 1]} : vector<18x16xf32> to vector<16x16xf32>
    %35 = vector.broadcast %33 : f32 to vector<16x16xf32>
    %36 = arith.mulf %34, %35 : vector<16x16xf32>
    %37 = arith.addf %27, %36 : vector<16x16xf32>
    %c0_i32_28 = arith.constant 0 : i32
    %38 = arith.addi %11, %c0_i32_28 : i32
    %c9_i32_29 = arith.constant 9 : i32
    %39 = arith.muli %38, %c9_i32_29 : i32
    %c6_i32 = arith.constant 6 : i32
    %40 = arith.addi %39, %c6_i32 : i32
    %c0_i32_30 = arith.constant 0 : i32
    %41 = arith.addi %40, %c0_i32_30 : i32
    %42 = arith.index_cast %41 : i32 to index
    %43 = memref.load %arg3[%42] : memref<36xf32, #tpu.memory_space<smem>>
    %44 = vector.extract_strided_slice %17 {offsets = [2, 0], sizes = [16, 16], strides = [1, 1]} : vector<18x16xf32> to vector<16x16xf32>
    %45 = vector.broadcast %43 : f32 to vector<16x16xf32>
    %46 = arith.mulf %44, %45 : vector<16x16xf32>
    %47 = arith.addf %37, %46 : vector<16x16xf32>
    %c0_31 = arith.constant 0 : index
    %c0_32 = arith.constant 0 : index
    %c1_33 = arith.constant 1 : index
    %48 = vector.load %arg6[%c0_31, %c0_32, %c1_33] : memref<4x18x18xf32, #tpu.memory_space<vmem>>, vector<1x18x16xf32>
    %49 = vector.shape_cast %48 : vector<1x18x16xf32> to vector<18x16xf32>
    %c0_i32_34 = arith.constant 0 : i32
    %50 = arith.addi %11, %c0_i32_34 : i32
    %c9_i32_35 = arith.constant 9 : i32
    %51 = arith.muli %50, %c9_i32_35 : i32
    %c0_i32_36 = arith.constant 0 : i32
    %52 = arith.addi %51, %c0_i32_36 : i32
    %c1_i32 = arith.constant 1 : i32
    %53 = arith.addi %52, %c1_i32 : i32
    %54 = arith.index_cast %53 : i32 to index
    %55 = memref.load %arg3[%54] : memref<36xf32, #tpu.memory_space<smem>>
    %56 = vector.extract_strided_slice %49 {offsets = [0, 0], sizes = [16, 16], strides = [1, 1]} : vector<18x16xf32> to vector<16x16xf32>
    %57 = vector.broadcast %55 : f32 to vector<16x16xf32>
    %58 = arith.mulf %56, %57 : vector<16x16xf32>
    %59 = arith.addf %47, %58 : vector<16x16xf32>
    %c0_i32_37 = arith.constant 0 : i32
    %60 = arith.addi %11, %c0_i32_37 : i32
    %c9_i32_38 = arith.constant 9 : i32
    %61 = arith.muli %60, %c9_i32_38 : i32
    %c3_i32_39 = arith.constant 3 : i32
    %62 = arith.addi %61, %c3_i32_39 : i32
    %c1_i32_40 = arith.constant 1 : i32
    %63 = arith.addi %62, %c1_i32_40 : i32
    %64 = arith.index_cast %63 : i32 to index
    %65 = memref.load %arg3[%64] : memref<36xf32, #tpu.memory_space<smem>>
    %66 = vector.extract_strided_slice %49 {offsets = [1, 0], sizes = [16, 16], strides = [1, 1]} : vector<18x16xf32> to vector<16x16xf32>
    %67 = vector.broadcast %65 : f32 to vector<16x16xf32>
    %68 = arith.mulf %66, %67 : vector<16x16xf32>
    %69 = arith.addf %59, %68 : vector<16x16xf32>
    %c0_i32_41 = arith.constant 0 : i32
    %70 = arith.addi %11, %c0_i32_41 : i32
    %c9_i32_42 = arith.constant 9 : i32
    %71 = arith.muli %70, %c9_i32_42 : i32
    %c6_i32_43 = arith.constant 6 : i32
    %72 = arith.addi %71, %c6_i32_43 : i32
    %c1_i32_44 = arith.constant 1 : i32
    %73 = arith.addi %72, %c1_i32_44 : i32
    %74 = arith.index_cast %73 : i32 to index
    %75 = memref.load %arg3[%74] : memref<36xf32, #tpu.memory_space<smem>>
    %76 = vector.extract_strided_slice %49 {offsets = [2, 0], sizes = [16, 16], strides = [1, 1]} : vector<18x16xf32> to vector<16x16xf32>
    %77 = vector.broadcast %75 : f32 to vector<16x16xf32>
    %78 = arith.mulf %76, %77 : vector<16x16xf32>
    %79 = arith.addf %69, %78 : vector<16x16xf32>
    %c0_45 = arith.constant 0 : index
    %c0_46 = arith.constant 0 : index
    %c2 = arith.constant 2 : index
    %80 = vector.load %arg6[%c0_45, %c0_46, %c2] : memref<4x18x18xf32, #tpu.memory_space<vmem>>, vector<1x18x16xf32>
    %81 = vector.shape_cast %80 : vector<1x18x16xf32> to vector<18x16xf32>
    %c0_i32_47 = arith.constant 0 : i32
    %82 = arith.addi %11, %c0_i32_47 : i32
    %c9_i32_48 = arith.constant 9 : i32
    %83 = arith.muli %82, %c9_i32_48 : i32
    %c0_i32_49 = arith.constant 0 : i32
    %84 = arith.addi %83, %c0_i32_49 : i32
    %c2_i32 = arith.constant 2 : i32
    %85 = arith.addi %84, %c2_i32 : i32
    %86 = arith.index_cast %85 : i32 to index
    %87 = memref.load %arg3[%86] : memref<36xf32, #tpu.memory_space<smem>>
    %88 = vector.extract_strided_slice %81 {offsets = [0, 0], sizes = [16, 16], strides = [1, 1]} : vector<18x16xf32> to vector<16x16xf32>
    %89 = vector.broadcast %87 : f32 to vector<16x16xf32>
    %90 = arith.mulf %88, %89 : vector<16x16xf32>
    %91 = arith.addf %79, %90 : vector<16x16xf32>
    %c0_i32_50 = arith.constant 0 : i32
    %92 = arith.addi %11, %c0_i32_50 : i32
    %c9_i32_51 = arith.constant 9 : i32
    %93 = arith.muli %92, %c9_i32_51 : i32
    %c3_i32_52 = arith.constant 3 : i32
    %94 = arith.addi %93, %c3_i32_52 : i32
    %c2_i32_53 = arith.constant 2 : i32
    %95 = arith.addi %94, %c2_i32_53 : i32
    %96 = arith.index_cast %95 : i32 to index
    %97 = memref.load %arg3[%96] : memref<36xf32, #tpu.memory_space<smem>>
    %98 = vector.extract_strided_slice %81 {offsets = [1, 0], sizes = [16, 16], strides = [1, 1]} : vector<18x16xf32> to vector<16x16xf32>
    %99 = vector.broadcast %97 : f32 to vector<16x16xf32>
    %100 = arith.mulf %98, %99 : vector<16x16xf32>
    %101 = arith.addf %91, %100 : vector<16x16xf32>
    %c0_i32_54 = arith.constant 0 : i32
    %102 = arith.addi %11, %c0_i32_54 : i32
    %c9_i32_55 = arith.constant 9 : i32
    %103 = arith.muli %102, %c9_i32_55 : i32
    %c6_i32_56 = arith.constant 6 : i32
    %104 = arith.addi %103, %c6_i32_56 : i32
    %c2_i32_57 = arith.constant 2 : i32
    %105 = arith.addi %104, %c2_i32_57 : i32
    %106 = arith.index_cast %105 : i32 to index
    %107 = memref.load %arg3[%106] : memref<36xf32, #tpu.memory_space<smem>>
    %108 = vector.extract_strided_slice %81 {offsets = [2, 0], sizes = [16, 16], strides = [1, 1]} : vector<18x16xf32> to vector<16x16xf32>
    %109 = vector.broadcast %107 : f32 to vector<16x16xf32>
    %110 = arith.mulf %108, %109 : vector<16x16xf32>
    %111 = arith.addf %101, %110 : vector<16x16xf32>
    %cst_58 = arith.constant 0.000000e+00 : f32
    %112 = vector.broadcast %cst_58 : f32 to vector<16x16xf32>
    %113 = arith.maximumf %111, %112 : vector<16x16xf32>
    %c0_59 = arith.constant 0 : index
    %c0_60 = arith.constant 0 : index
    %c0_61 = arith.constant 0 : index
    %c0_62 = arith.constant 0 : index
    %114 = vector.load %arg5[%c0_59, %c0_60, %c0_61, %c0_62] : memref<1x4x16x16xf32, #tpu.memory_space<vmem>>, vector<1x1x16x16xf32>
    %115 = vector.shape_cast %114 : vector<1x1x16x16xf32> to vector<16x16xf32>
    %116 = vector.shape_cast %113 : vector<16x16xf32> to vector<1x1x16x16xf32>
    tpu.vector_store %arg5[%c0_59, %c0_60, %c0_61, %c0_62], %116 {strides = array<i32>} : memref<1x4x16x16xf32, #tpu.memory_space<vmem>>, vector<1x1x16x16xf32>,
    %c1_i32_63 = arith.constant 1 : i32
    %117 = arith.addi %11, %c1_i32_63 : i32
    %118 = arith.index_cast %117 : i32 to index
    %119 = memref.load %arg4[%118] : memref<4xf32, #tpu.memory_space<smem>>
    %120 = vector.broadcast %119 : f32 to vector<16x16xf32>
    %c1_64 = arith.constant 1 : index
    %c0_65 = arith.constant 0 : index
    %c0_66 = arith.constant 0 : index
    %121 = vector.load %arg6[%c1_64, %c0_65, %c0_66] : memref<4x18x18xf32, #tpu.memory_space<vmem>>, vector<1x18x16xf32>
    %122 = vector.shape_cast %121 : vector<1x18x16xf32> to vector<18x16xf32>
    %c1_i32_67 = arith.constant 1 : i32
    %123 = arith.addi %11, %c1_i32_67 : i32
    %c9_i32_68 = arith.constant 9 : i32
    %124 = arith.muli %123, %c9_i32_68 : i32
    %c0_i32_69 = arith.constant 0 : i32
    %125 = arith.addi %124, %c0_i32_69 : i32
    %c0_i32_70 = arith.constant 0 : i32
    %126 = arith.addi %125, %c0_i32_70 : i32
    %127 = arith.index_cast %126 : i32 to index
    %128 = memref.load %arg3[%127] : memref<36xf32, #tpu.memory_space<smem>>
    %129 = vector.extract_strided_slice %122 {offsets = [0, 0], sizes = [16, 16], strides = [1, 1]} : vector<18x16xf32> to vector<16x16xf32>
    %130 = vector.broadcast %128 : f32 to vector<16x16xf32>
    %131 = arith.mulf %129, %130 : vector<16x16xf32>
    %132 = arith.addf %120, %131 : vector<16x16xf32>
    %c1_i32_71 = arith.constant 1 : i32
    %133 = arith.addi %11, %c1_i32_71 : i32
    %c9_i32_72 = arith.constant 9 : i32
    %134 = arith.muli %133, %c9_i32_72 : i32
    %c3_i32_73 = arith.constant 3 : i32
    %135 = arith.addi %134, %c3_i32_73 : i32
    %c0_i32_74 = arith.constant 0 : i32
    %136 = arith.addi %135, %c0_i32_74 : i32
    %137 = arith.index_cast %136 : i32 to index
    %138 = memref.load %arg3[%137] : memref<36xf32, #tpu.memory_space<smem>>
    %139 = vector.extract_strided_slice %122 {offsets = [1, 0], sizes = [16, 16], strides = [1, 1]} : vector<18x16xf32> to vector<16x16xf32>
    %140 = vector.broadcast %138 : f32 to vector<16x16xf32>
    %141 = arith.mulf %139, %140 : vector<16x16xf32>
    %142 = arith.addf %132, %141 : vector<16x16xf32>
    %c1_i32_75 = arith.constant 1 : i32
    %143 = arith.addi %11, %c1_i32_75 : i32
    %c9_i32_76 = arith.constant 9 : i32
    %144 = arith.muli %143, %c9_i32_76 : i32
    %c6_i32_77 = arith.constant 6 : i32
    %145 = arith.addi %144, %c6_i32_77 : i32
    %c0_i32_78 = arith.constant 0 : i32
    %146 = arith.addi %145, %c0_i32_78 : i32
    %147 = arith.index_cast %146 : i32 to index
    %148 = memref.load %arg3[%147] : memref<36xf32, #tpu.memory_space<smem>>
    %149 = vector.extract_strided_slice %122 {offsets = [2, 0], sizes = [16, 16], strides = [1, 1]} : vector<18x16xf32> to vector<16x16xf32>
    %150 = vector.broadcast %148 : f32 to vector<16x16xf32>
    %151 = arith.mulf %149, %150 : vector<16x16xf32>
    %152 = arith.addf %142, %151 : vector<16x16xf32>
    %c1_79 = arith.constant 1 : index
    %c0_80 = arith.constant 0 : index
    %c1_81 = arith.constant 1 : index
    %153 = vector.load %arg6[%c1_79, %c0_80, %c1_81] : memref<4x18x18xf32, #tpu.memory_space<vmem>>, vector<1x18x16xf32>
    %154 = vector.shape_cast %153 : vector<1x18x16xf32> to vector<18x16xf32>
    %c1_i32_82 = arith.constant 1 : i32
    %155 = arith.addi %11, %c1_i32_82 : i32
    %c9_i32_83 = arith.constant 9 : i32
    %156 = arith.muli %155, %c9_i32_83 : i32
    %c0_i32_84 = arith.constant 0 : i32
    %157 = arith.addi %156, %c0_i32_84 : i32
    %c1_i32_85 = arith.constant 1 : i32
    %158 = arith.addi %157, %c1_i32_85 : i32
    %159 = arith.index_cast %158 : i32 to index
    %160 = memref.load %arg3[%159] : memref<36xf32, #tpu.memory_space<smem>>
    %161 = vector.extract_strided_slice %154 {offsets = [0, 0], sizes = [16, 16], strides = [1, 1]} : vector<18x16xf32> to vector<16x16xf32>
    %162 = vector.broadcast %160 : f32 to vector<16x16xf32>
    %163 = arith.mulf %161, %162 : vector<16x16xf32>
    %164 = arith.addf %152, %163 : vector<16x16xf32>
    %c1_i32_86 = arith.constant 1 : i32
    %165 = arith.addi %11, %c1_i32_86 : i32
    %c9_i32_87 = arith.constant 9 : i32
    %166 = arith.muli %165, %c9_i32_87 : i32
    %c3_i32_88 = arith.constant 3 : i32
    %167 = arith.addi %166, %c3_i32_88 : i32
    %c1_i32_89 = arith.constant 1 : i32
    %168 = arith.addi %167, %c1_i32_89 : i32
    %169 = arith.index_cast %168 : i32 to index
    %170 = memref.load %arg3[%169] : memref<36xf32, #tpu.memory_space<smem>>
    %171 = vector.extract_strided_slice %154 {offsets = [1, 0], sizes = [16, 16], strides = [1, 1]} : vector<18x16xf32> to vector<16x16xf32>
    %172 = vector.broadcast %170 : f32 to vector<16x16xf32>
    %173 = arith.mulf %171, %172 : vector<16x16xf32>
    %174 = arith.addf %164, %173 : vector<16x16xf32>
    %c1_i32_90 = arith.constant 1 : i32
    %175 = arith.addi %11, %c1_i32_90 : i32
    %c9_i32_91 = arith.constant 9 : i32
    %176 = arith.muli %175, %c9_i32_91 : i32
    %c6_i32_92 = arith.constant 6 : i32
    %177 = arith.addi %176, %c6_i32_92 : i32
    %c1_i32_93 = arith.constant 1 : i32
    %178 = arith.addi %177, %c1_i32_93 : i32
    %179 = arith.index_cast %178 : i32 to index
    %180 = memref.load %arg3[%179] : memref<36xf32, #tpu.memory_space<smem>>
    %181 = vector.extract_strided_slice %154 {offsets = [2, 0], sizes = [16, 16], strides = [1, 1]} : vector<18x16xf32> to vector<16x16xf32>
    %182 = vector.broadcast %180 : f32 to vector<16x16xf32>
    %183 = arith.mulf %181, %182 : vector<16x16xf32>
    %184 = arith.addf %174, %183 : vector<16x16xf32>
    %c1_94 = arith.constant 1 : index
    %c0_95 = arith.constant 0 : index
    %c2_96 = arith.constant 2 : index
    %185 = vector.load %arg6[%c1_94, %c0_95, %c2_96] : memref<4x18x18xf32, #tpu.memory_space<vmem>>, vector<1x18x16xf32>
    %186 = vector.shape_cast %185 : vector<1x18x16xf32> to vector<18x16xf32>
    %c1_i32_97 = arith.constant 1 : i32
    %187 = arith.addi %11, %c1_i32_97 : i32
    %c9_i32_98 = arith.constant 9 : i32
    %188 = arith.muli %187, %c9_i32_98 : i32
    %c0_i32_99 = arith.constant 0 : i32
    %189 = arith.addi %188, %c0_i32_99 : i32
    %c2_i32_100 = arith.constant 2 : i32
    %190 = arith.addi %189, %c2_i32_100 : i32
    %191 = arith.index_cast %190 : i32 to index
    %192 = memref.load %arg3[%191] : memref<36xf32, #tpu.memory_space<smem>>
    %193 = vector.extract_strided_slice %186 {offsets = [0, 0], sizes = [16, 16], strides = [1, 1]} : vector<18x16xf32> to vector<16x16xf32>
    %194 = vector.broadcast %192 : f32 to vector<16x16xf32>
    %195 = arith.mulf %193, %194 : vector<16x16xf32>
    %196 = arith.addf %184, %195 : vector<16x16xf32>
    %c1_i32_101 = arith.constant 1 : i32
    %197 = arith.addi %11, %c1_i32_101 : i32
    %c9_i32_102 = arith.constant 9 : i32
    %198 = arith.muli %197, %c9_i32_102 : i32
    %c3_i32_103 = arith.constant 3 : i32
    %199 = arith.addi %198, %c3_i32_103 : i32
    %c2_i32_104 = arith.constant 2 : i32
    %200 = arith.addi %199, %c2_i32_104 : i32
    %201 = arith.index_cast %200 : i32 to index
    %202 = memref.load %arg3[%201] : memref<36xf32, #tpu.memory_space<smem>>
    %203 = vector.extract_strided_slice %186 {offsets = [1, 0], sizes = [16, 16], strides = [1, 1]} : vector<18x16xf32> to vector<16x16xf32>
    %204 = vector.broadcast %202 : f32 to vector<16x16xf32>
    %205 = arith.mulf %203, %204 : vector<16x16xf32>
    %206 = arith.addf %196, %205 : vector<16x16xf32>
    %c1_i32_105 = arith.constant 1 : i32
    %207 = arith.addi %11, %c1_i32_105 : i32
    %c9_i32_106 = arith.constant 9 : i32
    %208 = arith.muli %207, %c9_i32_106 : i32
    %c6_i32_107 = arith.constant 6 : i32
    %209 = arith.addi %208, %c6_i32_107 : i32
    %c2_i32_108 = arith.constant 2 : i32
    %210 = arith.addi %209, %c2_i32_108 : i32
    %211 = arith.index_cast %210 : i32 to index
    %212 = memref.load %arg3[%211] : memref<36xf32, #tpu.memory_space<smem>>
    %213 = vector.extract_strided_slice %186 {offsets = [2, 0], sizes = [16, 16], strides = [1, 1]} : vector<18x16xf32> to vector<16x16xf32>
    %214 = vector.broadcast %212 : f32 to vector<16x16xf32>
    %215 = arith.mulf %213, %214 : vector<16x16xf32>
    %216 = arith.addf %206, %215 : vector<16x16xf32>
    %cst_109 = arith.constant 0.000000e+00 : f32
    %217 = vector.broadcast %cst_109 : f32 to vector<16x16xf32>
    %218 = arith.maximumf %216, %217 : vector<16x16xf32>
    %c0_110 = arith.constant 0 : index
    %c1_111 = arith.constant 1 : index
    %c0_112 = arith.constant 0 : index
    %c0_113 = arith.constant 0 : index
    %219 = vector.load %arg5[%c0_110, %c1_111, %c0_112, %c0_113] : memref<1x4x16x16xf32, #tpu.memory_space<vmem>>, vector<1x1x16x16xf32>
    %220 = vector.shape_cast %219 : vector<1x1x16x16xf32> to vector<16x16xf32>
    %221 = vector.shape_cast %218 : vector<16x16xf32> to vector<1x1x16x16xf32>
    tpu.vector_store %arg5[%c0_110, %c1_111, %c0_112, %c0_113], %221 {strides = array<i32>} : memref<1x4x16x16xf32, #tpu.memory_space<vmem>>, vector<1x1x16x16xf32>,
    %c2_i32_114 = arith.constant 2 : i32
    %222 = arith.addi %11, %c2_i32_114 : i32
    %223 = arith.index_cast %222 : i32 to index
    %224 = memref.load %arg4[%223] : memref<4xf32, #tpu.memory_space<smem>>
    %225 = vector.broadcast %224 : f32 to vector<16x16xf32>
    %c2_115 = arith.constant 2 : index
    %c0_116 = arith.constant 0 : index
    %c0_117 = arith.constant 0 : index
    %226 = vector.load %arg6[%c2_115, %c0_116, %c0_117] : memref<4x18x18xf32, #tpu.memory_space<vmem>>, vector<1x18x16xf32>
    %227 = vector.shape_cast %226 : vector<1x18x16xf32> to vector<18x16xf32>
    %c2_i32_118 = arith.constant 2 : i32
    %228 = arith.addi %11, %c2_i32_118 : i32
    %c9_i32_119 = arith.constant 9 : i32
    %229 = arith.muli %228, %c9_i32_119 : i32
    %c0_i32_120 = arith.constant 0 : i32
    %230 = arith.addi %229, %c0_i32_120 : i32
    %c0_i32_121 = arith.constant 0 : i32
    %231 = arith.addi %230, %c0_i32_121 : i32
    %232 = arith.index_cast %231 : i32 to index
    %233 = memref.load %arg3[%232] : memref<36xf32, #tpu.memory_space<smem>>
    %234 = vector.extract_strided_slice %227 {offsets = [0, 0], sizes = [16, 16], strides = [1, 1]} : vector<18x16xf32> to vector<16x16xf32>
    %235 = vector.broadcast %233 : f32 to vector<16x16xf32>
    %236 = arith.mulf %234, %235 : vector<16x16xf32>
    %237 = arith.addf %225, %236 : vector<16x16xf32>
    %c2_i32_122 = arith.constant 2 : i32
    %238 = arith.addi %11, %c2_i32_122 : i32
    %c9_i32_123 = arith.constant 9 : i32
    %239 = arith.muli %238, %c9_i32_123 : i32
    %c3_i32_124 = arith.constant 3 : i32
    %240 = arith.addi %239, %c3_i32_124 : i32
    %c0_i32_125 = arith.constant 0 : i32
    %241 = arith.addi %240, %c0_i32_125 : i32
    %242 = arith.index_cast %241 : i32 to index
    %243 = memref.load %arg3[%242] : memref<36xf32, #tpu.memory_space<smem>>
    %244 = vector.extract_strided_slice %227 {offsets = [1, 0], sizes = [16, 16], strides = [1, 1]} : vector<18x16xf32> to vector<16x16xf32>
    %245 = vector.broadcast %243 : f32 to vector<16x16xf32>
    %246 = arith.mulf %244, %245 : vector<16x16xf32>
    %247 = arith.addf %237, %246 : vector<16x16xf32>
    %c2_i32_126 = arith.constant 2 : i32
    %248 = arith.addi %11, %c2_i32_126 : i32
    %c9_i32_127 = arith.constant 9 : i32
    %249 = arith.muli %248, %c9_i32_127 : i32
    %c6_i32_128 = arith.constant 6 : i32
    %250 = arith.addi %249, %c6_i32_128 : i32
    %c0_i32_129 = arith.constant 0 : i32
    %251 = arith.addi %250, %c0_i32_129 : i32
    %252 = arith.index_cast %251 : i32 to index
    %253 = memref.load %arg3[%252] : memref<36xf32, #tpu.memory_space<smem>>
    %254 = vector.extract_strided_slice %227 {offsets = [2, 0], sizes = [16, 16], strides = [1, 1]} : vector<18x16xf32> to vector<16x16xf32>
    %255 = vector.broadcast %253 : f32 to vector<16x16xf32>
    %256 = arith.mulf %254, %255 : vector<16x16xf32>
    %257 = arith.addf %247, %256 : vector<16x16xf32>
    %c2_130 = arith.constant 2 : index
    %c0_131 = arith.constant 0 : index
    %c1_132 = arith.constant 1 : index
    %258 = vector.load %arg6[%c2_130, %c0_131, %c1_132] : memref<4x18x18xf32, #tpu.memory_space<vmem>>, vector<1x18x16xf32>
    %259 = vector.shape_cast %258 : vector<1x18x16xf32> to vector<18x16xf32>
    %c2_i32_133 = arith.constant 2 : i32
    %260 = arith.addi %11, %c2_i32_133 : i32
    %c9_i32_134 = arith.constant 9 : i32
    %261 = arith.muli %260, %c9_i32_134 : i32
    %c0_i32_135 = arith.constant 0 : i32
    %262 = arith.addi %261, %c0_i32_135 : i32
    %c1_i32_136 = arith.constant 1 : i32
    %263 = arith.addi %262, %c1_i32_136 : i32
    %264 = arith.index_cast %263 : i32 to index
    %265 = memref.load %arg3[%264] : memref<36xf32, #tpu.memory_space<smem>>
    %266 = vector.extract_strided_slice %259 {offsets = [0, 0], sizes = [16, 16], strides = [1, 1]} : vector<18x16xf32> to vector<16x16xf32>
    %267 = vector.broadcast %265 : f32 to vector<16x16xf32>
    %268 = arith.mulf %266, %267 : vector<16x16xf32>
    %269 = arith.addf %257, %268 : vector<16x16xf32>
    %c2_i32_137 = arith.constant 2 : i32
    %270 = arith.addi %11, %c2_i32_137 : i32
    %c9_i32_138 = arith.constant 9 : i32
    %271 = arith.muli %270, %c9_i32_138 : i32
    %c3_i32_139 = arith.constant 3 : i32
    %272 = arith.addi %271, %c3_i32_139 : i32
    %c1_i32_140 = arith.constant 1 : i32
    %273 = arith.addi %272, %c1_i32_140 : i32
    %274 = arith.index_cast %273 : i32 to index
    %275 = memref.load %arg3[%274] : memref<36xf32, #tpu.memory_space<smem>>
    %276 = vector.extract_strided_slice %259 {offsets = [1, 0], sizes = [16, 16], strides = [1, 1]} : vector<18x16xf32> to vector<16x16xf32>
    %277 = vector.broadcast %275 : f32 to vector<16x16xf32>
    %278 = arith.mulf %276, %277 : vector<16x16xf32>
    %279 = arith.addf %269, %278 : vector<16x16xf32>
    %c2_i32_141 = arith.constant 2 : i32
    %280 = arith.addi %11, %c2_i32_141 : i32
    %c9_i32_142 = arith.constant 9 : i32
    %281 = arith.muli %280, %c9_i32_142 : i32
    %c6_i32_143 = arith.constant 6 : i32
    %282 = arith.addi %281, %c6_i32_143 : i32
    %c1_i32_144 = arith.constant 1 : i32
    %283 = arith.addi %282, %c1_i32_144 : i32
    %284 = arith.index_cast %283 : i32 to index
    %285 = memref.load %arg3[%284] : memref<36xf32, #tpu.memory_space<smem>>
    %286 = vector.extract_strided_slice %259 {offsets = [2, 0], sizes = [16, 16], strides = [1, 1]} : vector<18x16xf32> to vector<16x16xf32>
    %287 = vector.broadcast %285 : f32 to vector<16x16xf32>
    %288 = arith.mulf %286, %287 : vector<16x16xf32>
    %289 = arith.addf %279, %288 : vector<16x16xf32>
    %c2_145 = arith.constant 2 : index
    %c0_146 = arith.constant 0 : index
    %c2_147 = arith.constant 2 : index
    %290 = vector.load %arg6[%c2_145, %c0_146, %c2_147] : memref<4x18x18xf32, #tpu.memory_space<vmem>>, vector<1x18x16xf32>
    %291 = vector.shape_cast %290 : vector<1x18x16xf32> to vector<18x16xf32>
    %c2_i32_148 = arith.constant 2 : i32
    %292 = arith.addi %11, %c2_i32_148 : i32
    %c9_i32_149 = arith.constant 9 : i32
    %293 = arith.muli %292, %c9_i32_149 : i32
    %c0_i32_150 = arith.constant 0 : i32
    %294 = arith.addi %293, %c0_i32_150 : i32
    %c2_i32_151 = arith.constant 2 : i32
    %295 = arith.addi %294, %c2_i32_151 : i32
    %296 = arith.index_cast %295 : i32 to index
    %297 = memref.load %arg3[%296] : memref<36xf32, #tpu.memory_space<smem>>
    %298 = vector.extract_strided_slice %291 {offsets = [0, 0], sizes = [16, 16], strides = [1, 1]} : vector<18x16xf32> to vector<16x16xf32>
    %299 = vector.broadcast %297 : f32 to vector<16x16xf32>
    %300 = arith.mulf %298, %299 : vector<16x16xf32>
    %301 = arith.addf %289, %300 : vector<16x16xf32>
    %c2_i32_152 = arith.constant 2 : i32
    %302 = arith.addi %11, %c2_i32_152 : i32
    %c9_i32_153 = arith.constant 9 : i32
    %303 = arith.muli %302, %c9_i32_153 : i32
    %c3_i32_154 = arith.constant 3 : i32
    %304 = arith.addi %303, %c3_i32_154 : i32
    %c2_i32_155 = arith.constant 2 : i32
    %305 = arith.addi %304, %c2_i32_155 : i32
    %306 = arith.index_cast %305 : i32 to index
    %307 = memref.load %arg3[%306] : memref<36xf32, #tpu.memory_space<smem>>
    %308 = vector.extract_strided_slice %291 {offsets = [1, 0], sizes = [16, 16], strides = [1, 1]} : vector<18x16xf32> to vector<16x16xf32>
    %309 = vector.broadcast %307 : f32 to vector<16x16xf32>
    %310 = arith.mulf %308, %309 : vector<16x16xf32>
    %311 = arith.addf %301, %310 : vector<16x16xf32>
    %c2_i32_156 = arith.constant 2 : i32
    %312 = arith.addi %11, %c2_i32_156 : i32
    %c9_i32_157 = arith.constant 9 : i32
    %313 = arith.muli %312, %c9_i32_157 : i32
    %c6_i32_158 = arith.constant 6 : i32
    %314 = arith.addi %313, %c6_i32_158 : i32
    %c2_i32_159 = arith.constant 2 : i32
    %315 = arith.addi %314, %c2_i32_159 : i32
    %316 = arith.index_cast %315 : i32 to index
    %317 = memref.load %arg3[%316] : memref<36xf32, #tpu.memory_space<smem>>
    %318 = vector.extract_strided_slice %291 {offsets = [2, 0], sizes = [16, 16], strides = [1, 1]} : vector<18x16xf32> to vector<16x16xf32>
    %319 = vector.broadcast %317 : f32 to vector<16x16xf32>
    %320 = arith.mulf %318, %319 : vector<16x16xf32>
    %321 = arith.addf %311, %320 : vector<16x16xf32>
    %cst_160 = arith.constant 0.000000e+00 : f32
    %322 = vector.broadcast %cst_160 : f32 to vector<16x16xf32>
    %323 = arith.maximumf %321, %322 : vector<16x16xf32>
    %c0_161 = arith.constant 0 : index
    %c2_162 = arith.constant 2 : index
    %c0_163 = arith.constant 0 : index
    %c0_164 = arith.constant 0 : index
    %324 = vector.load %arg5[%c0_161, %c2_162, %c0_163, %c0_164] : memref<1x4x16x16xf32, #tpu.memory_space<vmem>>, vector<1x1x16x16xf32>
    %325 = vector.shape_cast %324 : vector<1x1x16x16xf32> to vector<16x16xf32>
    %326 = vector.shape_cast %323 : vector<16x16xf32> to vector<1x1x16x16xf32>
    tpu.vector_store %arg5[%c0_161, %c2_162, %c0_163, %c0_164], %326 {strides = array<i32>} : memref<1x4x16x16xf32, #tpu.memory_space<vmem>>, vector<1x1x16x16xf32>,
    %c3_i32_165 = arith.constant 3 : i32
    %327 = arith.addi %11, %c3_i32_165 : i32
    %328 = arith.index_cast %327 : i32 to index
    %329 = memref.load %arg4[%328] : memref<4xf32, #tpu.memory_space<smem>>
    %330 = vector.broadcast %329 : f32 to vector<16x16xf32>
    %c3 = arith.constant 3 : index
    %c0_166 = arith.constant 0 : index
    %c0_167 = arith.constant 0 : index
    %331 = vector.load %arg6[%c3, %c0_166, %c0_167] : memref<4x18x18xf32, #tpu.memory_space<vmem>>, vector<1x18x16xf32>
    %332 = vector.shape_cast %331 : vector<1x18x16xf32> to vector<18x16xf32>
    %c3_i32_168 = arith.constant 3 : i32
    %333 = arith.addi %11, %c3_i32_168 : i32
    %c9_i32_169 = arith.constant 9 : i32
    %334 = arith.muli %333, %c9_i32_169 : i32
    %c0_i32_170 = arith.constant 0 : i32
    %335 = arith.addi %334, %c0_i32_170 : i32
    %c0_i32_171 = arith.constant 0 : i32
    %336 = arith.addi %335, %c0_i32_171 : i32
    %337 = arith.index_cast %336 : i32 to index
    %338 = memref.load %arg3[%337] : memref<36xf32, #tpu.memory_space<smem>>
    %339 = vector.extract_strided_slice %332 {offsets = [0, 0], sizes = [16, 16], strides = [1, 1]} : vector<18x16xf32> to vector<16x16xf32>
    %340 = vector.broadcast %338 : f32 to vector<16x16xf32>
    %341 = arith.mulf %339, %340 : vector<16x16xf32>
    %342 = arith.addf %330, %341 : vector<16x16xf32>
    %c3_i32_172 = arith.constant 3 : i32
    %343 = arith.addi %11, %c3_i32_172 : i32
    %c9_i32_173 = arith.constant 9 : i32
    %344 = arith.muli %343, %c9_i32_173 : i32
    %c3_i32_174 = arith.constant 3 : i32
    %345 = arith.addi %344, %c3_i32_174 : i32
    %c0_i32_175 = arith.constant 0 : i32
    %346 = arith.addi %345, %c0_i32_175 : i32
    %347 = arith.index_cast %346 : i32 to index
    %348 = memref.load %arg3[%347] : memref<36xf32, #tpu.memory_space<smem>>
    %349 = vector.extract_strided_slice %332 {offsets = [1, 0], sizes = [16, 16], strides = [1, 1]} : vector<18x16xf32> to vector<16x16xf32>
    %350 = vector.broadcast %348 : f32 to vector<16x16xf32>
    %351 = arith.mulf %349, %350 : vector<16x16xf32>
    %352 = arith.addf %342, %351 : vector<16x16xf32>
    %c3_i32_176 = arith.constant 3 : i32
    %353 = arith.addi %11, %c3_i32_176 : i32
    %c9_i32_177 = arith.constant 9 : i32
    %354 = arith.muli %353, %c9_i32_177 : i32
    %c6_i32_178 = arith.constant 6 : i32
    %355 = arith.addi %354, %c6_i32_178 : i32
    %c0_i32_179 = arith.constant 0 : i32
    %356 = arith.addi %355, %c0_i32_179 : i32
    %357 = arith.index_cast %356 : i32 to index
    %358 = memref.load %arg3[%357] : memref<36xf32, #tpu.memory_space<smem>>
    %359 = vector.extract_strided_slice %332 {offsets = [2, 0], sizes = [16, 16], strides = [1, 1]} : vector<18x16xf32> to vector<16x16xf32>
    %360 = vector.broadcast %358 : f32 to vector<16x16xf32>
    %361 = arith.mulf %359, %360 : vector<16x16xf32>
    %362 = arith.addf %352, %361 : vector<16x16xf32>
    %c3_180 = arith.constant 3 : index
    %c0_181 = arith.constant 0 : index
    %c1_182 = arith.constant 1 : index
    %363 = vector.load %arg6[%c3_180, %c0_181, %c1_182] : memref<4x18x18xf32, #tpu.memory_space<vmem>>, vector<1x18x16xf32>
    %364 = vector.shape_cast %363 : vector<1x18x16xf32> to vector<18x16xf32>
    %c3_i32_183 = arith.constant 3 : i32
    %365 = arith.addi %11, %c3_i32_183 : i32
    %c9_i32_184 = arith.constant 9 : i32
    %366 = arith.muli %365, %c9_i32_184 : i32
    %c0_i32_185 = arith.constant 0 : i32
    %367 = arith.addi %366, %c0_i32_185 : i32
    %c1_i32_186 = arith.constant 1 : i32
    %368 = arith.addi %367, %c1_i32_186 : i32
    %369 = arith.index_cast %368 : i32 to index
    %370 = memref.load %arg3[%369] : memref<36xf32, #tpu.memory_space<smem>>
    %371 = vector.extract_strided_slice %364 {offsets = [0, 0], sizes = [16, 16], strides = [1, 1]} : vector<18x16xf32> to vector<16x16xf32>
    %372 = vector.broadcast %370 : f32 to vector<16x16xf32>
    %373 = arith.mulf %371, %372 : vector<16x16xf32>
    %374 = arith.addf %362, %373 : vector<16x16xf32>
    %c3_i32_187 = arith.constant 3 : i32
    %375 = arith.addi %11, %c3_i32_187 : i32
    %c9_i32_188 = arith.constant 9 : i32
    %376 = arith.muli %375, %c9_i32_188 : i32
    %c3_i32_189 = arith.constant 3 : i32
    %377 = arith.addi %376, %c3_i32_189 : i32
    %c1_i32_190 = arith.constant 1 : i32
    %378 = arith.addi %377, %c1_i32_190 : i32
    %379 = arith.index_cast %378 : i32 to index
    %380 = memref.load %arg3[%379] : memref<36xf32, #tpu.memory_space<smem>>
    %381 = vector.extract_strided_slice %364 {offsets = [1, 0], sizes = [16, 16], strides = [1, 1]} : vector<18x16xf32> to vector<16x16xf32>
    %382 = vector.broadcast %380 : f32 to vector<16x16xf32>
    %383 = arith.mulf %381, %382 : vector<16x16xf32>
    %384 = arith.addf %374, %383 : vector<16x16xf32>
    %c3_i32_191 = arith.constant 3 : i32
    %385 = arith.addi %11, %c3_i32_191 : i32
    %c9_i32_192 = arith.constant 9 : i32
    %386 = arith.muli %385, %c9_i32_192 : i32
    %c6_i32_193 = arith.constant 6 : i32
    %387 = arith.addi %386, %c6_i32_193 : i32
    %c1_i32_194 = arith.constant 1 : i32
    %388 = arith.addi %387, %c1_i32_194 : i32
    %389 = arith.index_cast %388 : i32 to index
    %390 = memref.load %arg3[%389] : memref<36xf32, #tpu.memory_space<smem>>
    %391 = vector.extract_strided_slice %364 {offsets = [2, 0], sizes = [16, 16], strides = [1, 1]} : vector<18x16xf32> to vector<16x16xf32>
    %392 = vector.broadcast %390 : f32 to vector<16x16xf32>
    %393 = arith.mulf %391, %392 : vector<16x16xf32>
    %394 = arith.addf %384, %393 : vector<16x16xf32>
    %c3_195 = arith.constant 3 : index
    %c0_196 = arith.constant 0 : index
    %c2_197 = arith.constant 2 : index
    %395 = vector.load %arg6[%c3_195, %c0_196, %c2_197] : memref<4x18x18xf32, #tpu.memory_space<vmem>>, vector<1x18x16xf32>
    %396 = vector.shape_cast %395 : vector<1x18x16xf32> to vector<18x16xf32>
    %c3_i32_198 = arith.constant 3 : i32
    %397 = arith.addi %11, %c3_i32_198 : i32
    %c9_i32_199 = arith.constant 9 : i32
    %398 = arith.muli %397, %c9_i32_199 : i32
    %c0_i32_200 = arith.constant 0 : i32
    %399 = arith.addi %398, %c0_i32_200 : i32
    %c2_i32_201 = arith.constant 2 : i32
    %400 = arith.addi %399, %c2_i32_201 : i32
    %401 = arith.index_cast %400 : i32 to index
    %402 = memref.load %arg3[%401] : memref<36xf32, #tpu.memory_space<smem>>
    %403 = vector.extract_strided_slice %396 {offsets = [0, 0], sizes = [16, 16], strides = [1, 1]} : vector<18x16xf32> to vector<16x16xf32>
    %404 = vector.broadcast %402 : f32 to vector<16x16xf32>
    %405 = arith.mulf %403, %404 : vector<16x16xf32>
    %406 = arith.addf %394, %405 : vector<16x16xf32>
    %c3_i32_202 = arith.constant 3 : i32
    %407 = arith.addi %11, %c3_i32_202 : i32
    %c9_i32_203 = arith.constant 9 : i32
    %408 = arith.muli %407, %c9_i32_203 : i32
    %c3_i32_204 = arith.constant 3 : i32
    %409 = arith.addi %408, %c3_i32_204 : i32
    %c2_i32_205 = arith.constant 2 : i32
    %410 = arith.addi %409, %c2_i32_205 : i32
    %411 = arith.index_cast %410 : i32 to index
    %412 = memref.load %arg3[%411] : memref<36xf32, #tpu.memory_space<smem>>
    %413 = vector.extract_strided_slice %396 {offsets = [1, 0], sizes = [16, 16], strides = [1, 1]} : vector<18x16xf32> to vector<16x16xf32>
    %414 = vector.broadcast %412 : f32 to vector<16x16xf32>
    %415 = arith.mulf %413, %414 : vector<16x16xf32>
    %416 = arith.addf %406, %415 : vector<16x16xf32>
    %c3_i32_206 = arith.constant 3 : i32
    %417 = arith.addi %11, %c3_i32_206 : i32
    %c9_i32_207 = arith.constant 9 : i32
    %418 = arith.muli %417, %c9_i32_207 : i32
    %c6_i32_208 = arith.constant 6 : i32
    %419 = arith.addi %418, %c6_i32_208 : i32
    %c2_i32_209 = arith.constant 2 : i32
    %420 = arith.addi %419, %c2_i32_209 : i32
    %421 = arith.index_cast %420 : i32 to index
    %422 = memref.load %arg3[%421] : memref<36xf32, #tpu.memory_space<smem>>
    %423 = vector.extract_strided_slice %396 {offsets = [2, 0], sizes = [16, 16], strides = [1, 1]} : vector<18x16xf32> to vector<16x16xf32>
    %424 = vector.broadcast %422 : f32 to vector<16x16xf32>
    %425 = arith.mulf %423, %424 : vector<16x16xf32>
    %426 = arith.addf %416, %425 : vector<16x16xf32>
    %cst_210 = arith.constant 0.000000e+00 : f32
    %427 = vector.broadcast %cst_210 : f32 to vector<16x16xf32>
    %428 = arith.maximumf %426, %427 : vector<16x16xf32>
    %c0_211 = arith.constant 0 : index
    %c3_212 = arith.constant 3 : index
    %c0_213 = arith.constant 0 : index
    %c0_214 = arith.constant 0 : index
    %429 = vector.load %arg5[%c0_211, %c3_212, %c0_213, %c0_214] : memref<1x4x16x16xf32, #tpu.memory_space<vmem>>, vector<1x1x16x16xf32>
    %430 = vector.shape_cast %429 : vector<1x1x16x16xf32> to vector<16x16xf32>
    %431 = vector.shape_cast %428 : vector<16x16xf32> to vector<1x1x16x16xf32>
    tpu.vector_store %arg5[%c0_211, %c3_212, %c0_213, %c0_214], %431 {strides = array<i32>} : memref<1x4x16x16xf32, #tpu.memory_space<vmem>>, vector<1x1x16x16xf32>,
    return
  }
  func.func @transform_0(%arg0: i32, %arg1: i32) -> (i32, i32, i32, i32) {
    %c0_i32 = arith.constant 0 : i32
    %c0_i32_0 = arith.constant 0 : i32
    %c0_i32_1 = arith.constant 0 : i32
    return %arg0, %arg1, %c0_i32, %c0_i32_0 : i32, i32, i32, i32
  }
  func.func @transform_1(%arg0: i32, %arg1: i32) -> i32 {
    %c0_i32 = arith.constant 0 : i32
    %c0_i32_0 = arith.constant 0 : i32
    return %c0_i32 : i32
  }
  func.func @transform_2(%arg0: i32, %arg1: i32) -> i32 {
    %c0_i32 = arith.constant 0 : i32
    %c0_i32_0 = arith.constant 0 : i32
    return %c0_i32 : i32
  }
  func.func @transform_3(%arg0: i32, %arg1: i32) -> (i32, i32, i32, i32) {
    %c0_i32 = arith.constant 0 : i32
    %c0_i32_0 = arith.constant 0 : i32
    %c0_i32_1 = arith.constant 0 : i32
    return %arg0, %arg1, %c0_i32, %c0_i32_0 : i32, i32, i32, i32
  }
}

</mosaic_0001>

<bundles_post_ra>
// kernel: tpu_custom_call.1
= control target key start
LH: loop header
LB: loop body
LE: loop exit
PB: predicated region body
PF: predicated region fallthrough
CT: control target
= control target key end

     0   :  { %s2346_s0 = inlined_call_operand.hbm [shape: f32[2,4,16,16], index: 0, kind: input, shape index: {}]   ;;  %s2347_s1 = inlined_call_operand.vmem [shape: f32[36], index: 1, kind: input, shape index: {}]   ;;  %s2348_s2 = inlined_call_operand.vmem [shape: f32[4], index: 2, kind: input, shape index: {}]   ;;  %s2349_s3 = inlined_call_operand.hbm [shape: f32[2,4,16,16], index: 3, kind: output, shape index: {}]  }
   0x1   :  { %2377 = sst [smem:[#allocation29_spill]] %s2346_s0 }
   0x2   :  { %2378 = sst [smem:[#allocation30_spill]] %s2347_s1 }
   0x3   :  { %2379 = sst [smem:[#allocation31_spill]] %s2348_s2 }
   0x4   :  { %2380 = sst [smem:[#allocation32_spill]] %s2349_s3 }
   0x5   :  { %8 = vsyncpa [#allocation4], 0 }
   0x6   :  { %10 = vsyncpa [#allocation4 + $0x1], 0 }
   0x7   :  { %11 = vsyncpa [#allocation6], 0 }
   0x8   :  { %12 = vsyncpa [#allocation9], 0 }
   0x9   :  { %13 = vsyncpa [#allocation5], 0 }
   0xa   :  { %15 = vsyncpa [#allocation5 + $0x1], 0  ;;  %s1468_s12 = smov 0   ;;  %s1470_s13 = smov 0  }
   0xb   :  { %s1472_s14 = smov 0   ;;  %s1474_s15 = smov 0  }
   0xc   :  { %s1476_s16 = smov 0   ;;  %s1478_s17 = smov 0  }
   0xd LB: > { %2381 = sst [smem:[#allocation15_spill]] %s1414_s12  ;;  %s1132_s18 = sadd.s32 4294967295, %s1434_s17   ;;  %s1434_s17 = sphi %s1478_s17, %s21_s17   ;;  %s1430_s16 = sphi %s1476_s16, %s2447_s16   ;;  %s1426_s15 = sphi %s1474_s15, %s2446_s15   ;;  %s1422_s14 = sphi %s1472_s14, %s2445_s14   ;;  %s1418_s13 = sphi %s1470_s13, %s2444_s13   ;;  %s1414_s12 = sphi %s1468_s12, %s2443_s12  }
   0xe   : > { %2382 = sst [smem:[#allocation16_spill]] %s1418_s13  ;;  %s1133_s19 = sadd.s32 4294967294, %s1434_s17  }
   0xf   : > { %2383 = sst [smem:[#allocation17_spill]] %s1422_s14  ;;  %s42_s20 = sadd.s32 1, %s1422_s14 }
  0x10   : > { %2384 = sst [smem:[#allocation18_spill]] %s1426_s15  ;;  %p49_p0 = scmp.ne.s32.totalorder %s1422_s14, %s1418_s13 }
  0x11   : > { %2385 = sst [smem:[#allocation19_spill]] %s1430_s16  ;;  %p50_p1 = scmp.eq.s32.totalorder %s1434_s17, 0 }
  0x12   : > { %2386 = sst [smem:[#allocation20_spill]] %s1434_s17  ;;  %p55_p2 = scmp.ne.s32.totalorder %s1418_s13, %s1414_s12 }
  0x13   : > { %p1506_p3 = scmp.eq.s32.totalorder %s1132_s18, 0  ;;  %p123_p4 = scmp.eq.s32.totalorder %s1132_s18, 1 }
  0x14   : > { %p1510_p5 = por %p50_p1, %p49_p0  ;;  %p129_p6 = scmp.eq.s32.totalorder %s1133_s19, 1 }
  0x15   : > { %s2387_s21 = scalar_select %p1506_p3, 1, 0 }
  0x16   : > { %p1516_p7 = por %p1506_p3, %p55_p2  ;;  %p1520_p8 = por %p123_p4, %p49_p0 }
  0x17   : > { %p1524_p9 = por %p129_p6, %p55_p2  ;;  %p1134_p10 = scmp.ge.s32.totalorder %s1434_s17, 1 }
  0x18   : > { %s2389_s23 = scalar_select %p1516_p7, 1, 0 }
  0x19   : > { %s2390_s24 = scalar_select %p1520_p8, 1, 0 }
  0x1a   : > { %s2392_s25 = scalar_select %p1524_p9, 1, 0 }
  0x1b   : > { %2391 = sst [smem:[#allocation21_spill]] %s2390_s24  ;;  %p136_p11 = scmp.lt.s32.totalorder %s1434_s17, 3 }
  0x1c   : > { %2393 = sst [smem:[#allocation22_spill]] %s2392_s25  ;;  %p1226_p0 = scmp.lt.s32.totalorder %s1434_s17, 2 }
  0x1d   : > { %s2394_s1 = sld [smem:[#allocation30_spill]]  ;;  %p1533_p12 = pnand %p1134_p10, %p136_p11 }
  0x1e   : > { %s2396_s2 = sld [smem:[#allocation31_spill]]  ;;  %p1546_p2 = pnand %p1226_p0, %p1510_p5 }
  0x1f   : > { %s2395_s29 = scalar_select %p1533_p12, 1, 0 }
  0x20   : > { %p1209_p1 = pneg %p1533_p12 }
  0x21   : > { %s2397_s6 = scalar_select %p1546_p2, 1, 0 }
  0x22   : > { %p1552_p4 = pnand %p1209_p1, %p1506_p3 }
  0x23   : > { %s149_s28 = sshll.u32 %s2394_s1, 4  ;;  %s150_s28 = int_to_ptr.vmem [resolvable:$true] %s149_s28 }
  0x24   : > { %s160_s5 = sshll.u32 %s2396_s2, 4  ;;  %s1288_s8 = scalar_lea.vmem %s150_s28, 16  ;;  %s161_s5 = int_to_ptr.vmem [resolvable:$true] %s160_s5 }
  0x25   : > { %p1289_p6 = scmp.ne.s32.totalorder %s150_s28, %s1288_s8  ;;  %p1290_p10 = pneg %p1552_p4 }
  0x26   : > { %p1296_p9 = scmp.lt.s32.totalorder %s150_s28, %s150_s28  ;;  %p1297_p8 = scmp.lt.s32.totalorder %s1288_s8, %s1288_s8 }
  0x27   : > { %p1291_p11 = pnand %p1290_p10, %p1289_p6 }
  0x28   : > { %p1298_p7 = por %p1297_p8, %p1296_p9 }
  0x29   : > { %p1292_p13 = pneg %p1291_p11 }
  0x2b   : > { %p1299_p5 = pnand %p1298_p7, %p1292_p13 }
  0x2d   : > { %1302 = shalt.err (!%p1299_p5)
}
  0x2e   : > { %s1436_s9 = smov [#allocation7]   ;;  %s1303_s10 = scalar_lea.vmem %s161_s5, 16 }
  0x2f   : > { %1212 = dma.vmem_to_smem (!%p1552_p4), %s150_s28, 16, %s1436_s9, [#allocation6]  }
  0x30   : > { %p1304_p0 = scmp.ne.s32.totalorder %s161_s5, %s1303_s10  ;;  %p1311_p12 = scmp.lt.s32.totalorder %s161_s5, %s161_s5 }
  0x31   : > { %p1312_p2 = scmp.lt.s32.totalorder %s1303_s10, %s1303_s10 }
  0x32   : > { %p1306_p1 = pnand %p1304_p0, %p1290_p10 }
  0x33   : > { %p1313_p6 = por %p1312_p2, %p1311_p12 }
  0x34   : > { %p1307_p3 = pneg %p1306_p1 }
  0x36   : > { %p1314_p11 = pnand %p1313_p6, %p1307_p3 }
  0x38   : > { %1317 = shalt.err (!%p1314_p11)
}
  0x39   : > { %s1437_s11 = smov [#allocation8]   ;;  %s33_s18 = sadd.s32 1, %s1430_s16 }
  0x3a   : > { %1215 = dma.vmem_to_smem (!%p1552_p4), %s161_s5, 16, %s1437_s11, [#allocation9]  }
  0x3b   : > { %s171_s19 = sand.u32 1, %s1422_s14   ;;  %p35_p7 = scmp.ge.s32.totalorder %s33_s18, 2 }
  0x3c   : > { %s1138_s22 = sshll.u32 %s171_s19, 6  ;;  %s1195_s26 = sshll.u32 %s1430_s16, 10 }
  0x3d   : > { %s2449_s18 = smov (%p35_p7, %s33_s18), 0  ;;  %s2400_s0 = sld [smem:[#allocation29_spill]] }
  0x3e   : > { %2399 = sst [smem:[#allocation23_spill]] %s2449_s18  ;;  %s37_s4 = ssub.s32 %s1430_s16, %s2449_s18 }
  0x3f   : > { %s175_s7 = scalar_lea.vmem [#allocation3], %s1138_s22  ;;  %p40_p3 = scmp.eq.s32.totalorder %s37_s4, 0 }
  0x40   : > { %s185_s8 = sshll.u32 %s175_s7, 4  ;;  %s172_s5 = scalar_lea.sflag [#allocation4], %s171_s19  ;;  %s186_s8 = int_to_ptr.vmem [resolvable:$true] %s185_s8 }
  0x41   : > { %s1575_s9 = scalar_select %p40_p3, %s1422_s14, %s42_s20  }
  0x42   : > { %p2402_p8 = scmp.ne.s32.totalorder %s2397_s6, 0  ;;  %s1331_s10 = scalar_lea.vmem %s186_s8, 1024 }
  0x43   : > { %s184_s30 = scalar_lea.hbm %s2400_s0, %s1195_s26  ;;  %2401 = sst [smem:[#allocation24_spill]] %s1575_s9 }
  0x44   : > { %p1320_p9 = pneg %p2402_p8  ;;  %p1332_p12 = scmp.ne.s32.totalorder %s186_s8, %s1331_s10 }
  0x45   : > { %s1438_s11 = smov [#allocation3]  }
  0x46   : > { %p1334_p13 = pnand %p1332_p12, %p1320_p9  ;;  %s1336_s1 = sshll.u32 %s1438_s11, 4  ;;  %s1337_s1 = int_to_ptr.vmem [resolvable:$false] %s1336_s1 }
  0x47   : > { %s1338_s27 = scalar_lea.vmem %s1337_s1, 2048  ;;  %p1339_p4 = scmp.lt.s32.totalorder %s186_s8, %s1337_s1 }
  0x48   : > { %p1335_p2 = pneg %p1334_p13  ;;  %p1340_p10 = scmp.lt.s32.totalorder %s1338_s27, %s1331_s10 }
  0x4a   : > { %p1341_p5 = por %p1340_p10, %p1339_p4 }
  0x4c   : > { %p1342_p0 = pnand %p1341_p5, %p1335_p2 }
  0x4e   : > { %1345 = shalt.err (!%p1342_p0)
}
  0x4f   : > { %s1439_s22 = smov 128   ;;  %s1440_s20 = smov 8  }
  0x50   : > { %1219 = dma.hbm_to_vmem [thread:$0]  (!%p2402_p8), %s184_s30, 1024, %s186_s8, %s172_s5, %s1439_s22, %s1439_s22, %s1440_s20  }
  0x51   : > { %p2403_p1 = scmp.ne.s32.totalorder %s2395_s29, 0 }
  0x53   : > { %197 = sbr.rel (%p2403_p1) target bundleno = 454 (0x1c6), region = 32 }
  0x58   : > { %s1584_s19 = sand.u32 1, %s1418_s13   ;;  %p2405_p6 = scmp.ne.s32.totalorder %s2389_s23, 0 }
  0x59   : > { %2404 = sst [smem:[#allocation25_spill]] %s1584_s19  ;;  %s2356_s1 = sshll.u32 %s1584_s19, 6 }
  0x5a   : > { %s200_s26 = scalar_lea.sflag [#allocation4], %s1584_s19  ;;  %s1590_s28 = scalar_lea.vmem [#allocation3], %s2356_s1 }
  0x5b   : > { %1397 = dma.done.wait (%p2405_p6), %s200_s26, 1024  }
  0x5c   : > { %1399 = vsyncadd (%p2405_p6), %s200_s26, 4294966272  ;;  %p2406_p11 = scmp.ne.s32.totalorder %s2387_s21, 0 }
  0x5e   : > { %1401 = dma.done.wait (%p2406_p11), [#allocation6], 16  }
  0x5f   : > { %1403 = vsyncadd (%p2406_p11), [#allocation6], 4294967280 }
  0x60   : > { %1405 = dma.done.wait (%p2406_p11), [#allocation9], 16  }
  0x61   : > { %1407 = vsyncadd (%p2406_p11), [#allocation9], 4294967280 }
  0x62   : > { %216 = sfence }
  0x63   : > { %v264_v0 = vld [vmem:[%s1590_s28] sm:$0xff]  ;;  %v266_v1 = vld [vmem:[%s1590_s28 + $0x10] sm:$0xff]  ;;  %s1441_s23 = smov 1   ;;  %vm246_vm0 = vcmask 7168   ;;  %vm255_vm1 = vcmask 146568   ;;  %vm237_vm2 = vcmask 139264  }
  0x64   : > { %280 = vrot.lane.b32.xlu0 %v264_v0, %s1441_s23  ;;  %284 = vrot.lane.b32.xlu1 %v266_v1, %s1441_s23  ;;  %v265_v2 = vld [vmem:[%s1590_s28 + $0x8] sm:$0xff]  ;;  %v267_v3 = vld [vmem:[%s1590_s28 + $0x18] sm:$0xff]  ;;  %v1442_v4 = vmov 0.0   ;;  %s1636_s21 = sld [smem:[#allocation7 + $0x1]]  ;;  %vm304_vm3 = vcmask 138248   ;;  %s1443_s19 = smov 127  }
  0x65   : > { %247 = vst.msk [vmem:[#allocation2 + $0x1] sm:$0xff] %vm246_vm0, %v1442_v4  ;;  %248 = vst.msk [vmem:[#allocation2 + $0x9] sm:$0xff] %vm246_vm0, %v1442_v4  ;;  %v268_v5 = vld [vmem:[%s1590_s28 + $0x20] sm:$0xff]  ;;  %v269_v6 = vld [vmem:[%s1590_s28 + $0x28] sm:$0xff]  ;;  %s1638_s29 = sld [smem:[#allocation7 + $0x2]]  ;;  %vm335_vm4 = vcmask 1046528  }
  0x66   : > { %249 = vst.msk [vmem:[#allocation2 + $0x19] sm:$0xff] %vm246_vm0, %v1442_v4  ;;  %250 = vst.msk [vmem:[#allocation2 + $0x21] sm:$0xff] %vm246_vm0, %v1442_v4  ;;  %v270_v7 = vld [vmem:[%s1590_s28 + $0x30] sm:$0xff]  ;;  %v271_v8 = vld [vmem:[%s1590_s28 + $0x38] sm:$0xff]  ;;  %s1640_s6 = sld [smem:[#allocation7 + $0xa]]  ;;  %vm354_vm5 = vcmask 1045504  }
  0x67   : > { %251 = vst.msk [vmem:[#allocation2 + $0x31] sm:$0xff] %vm246_vm0, %v1442_v4  ;;  %252 = vst.msk [vmem:[#allocation2 + $0x39] sm:$0xff] %vm246_vm0, %v1442_v4  ;;  %s1642_s30 = sld [smem:[#allocation7 + $0x13]]  ;;  %vm484_vm6 = vcmask 130048  }
  0x68   : > { %253 = vst.msk [vmem:[#allocation2 + $0x49] sm:$0xff] %vm246_vm0, %v1442_v4  ;;  %254 = vst.msk [vmem:[#allocation2 + $0x51] sm:$0xff] %vm246_vm0, %v1442_v4  ;;  %282 = vrot.lane.b32.xlu0 %v265_v2, %s1441_s23  ;;  %286 = vrot.lane.b32.xlu1 %v267_v3, %s1441_s23  ;;  %s1644_s4 = sld [smem:[#allocation7 + $0x1c]] }
  0x69   : > { %238 = vst.msk [vmem:[#allocation2] sm:$0x1] %vm237_vm2, %v1442_v4  ;;  %239 = vst.msk [vmem:[#allocation2 + $0x18] sm:$0x1] %vm237_vm2, %v1442_v4  ;;  %s1646_s7 = sld [smem:[#allocation7 + $0xb]] }
  0x6a   : > { %240 = vst.msk [vmem:[#allocation2 + $0x30] sm:$0x1] %vm237_vm2, %v1442_v4  ;;  %241 = vst.msk [vmem:[#allocation2 + $0x48] sm:$0x1] %vm237_vm2, %v1442_v4  ;;  %s1648_s8 = sld [smem:[#allocation7 + $0x14]]  ;;  %v366_v13 = vstv %s1636_s21 }
  0x6b   : > { %242 = vst.msk [vmem:[#allocation2 + $0x11] sm:$0x1] %vm237_vm2, %v1442_v4  ;;  %243 = vst.msk [vmem:[#allocation2 + $0x29] sm:$0x1] %vm237_vm2, %v1442_v4  ;;  %s1650_s5 = sld [smem:[#allocation7 + $0x1d]]  ;;  %v425_v18 = vstv %s1638_s29 }
  0x6c   : > { %244 = vst.msk [vmem:[#allocation2 + $0x41] sm:$0x1] %vm237_vm2, %v1442_v4  ;;  %245 = vst.msk [vmem:[#allocation2 + $0x59] sm:$0x1] %vm237_vm2, %v1442_v4  ;;  %288 = vrot.lane.b32.xlu0 %v268_v5, %s1441_s23  ;;  %290 = vrot.lane.b32.xlu1 %v269_v6, %s1441_s23  ;;  %s1652_s10 = sld [smem:[#allocation7 + $0x4]]  ;;  %v539_v22 = vstv %s1640_s6 }
  0x6d   : > { %256 = vst.msk [vmem:[#allocation2 + $0x1] sm:$0xff] %vm255_vm1, %v1442_v4  ;;  %258 = vst.msk [vmem:[#allocation2 + $0x19] sm:$0xff] %vm255_vm1, %v1442_v4  ;;  %s1654_s11 = sld [smem:[#allocation7 + $0x7]]  ;;  %v712_v25 = vstv %s1642_s30  ;;  %s1444_s30 = smov 126  }
  0x6e   : > { %257 = vst.msk [vmem:[#allocation2 + $0x9] sm:$0xff] %vm255_vm1, %v1442_v4  ;;  %259 = vst.msk [vmem:[#allocation2 + $0x21] sm:$0xff] %vm255_vm1, %v1442_v4  ;;  %s1656_s27 = sld [smem:[#allocation7 + $0x5]]  ;;  %v885_v26 = vstv %s1644_s4  ;;  %s1445_s4 = smov [#allocation10]  }
  0x6f   : > { %260 = vst.msk [vmem:[#allocation2 + $0x31] sm:$0xff] %vm255_vm1, %v1442_v4  ;;  %261 = vst.msk [vmem:[#allocation2 + $0x39] sm:$0xff] %vm255_vm1, %v1442_v4  ;;  %s1658_s22 = sld [smem:[#allocation7 + $0x8]]  ;;  %v598_v28 = vstv %s1646_s7  ;;  %s1350_s7 = sshll.u32 %s1445_s4, 4  ;;  %s1351_s7 = int_to_ptr.vmem [resolvable:$false] %s1350_s7 }
  0x70   : > { %262 = vst.msk [vmem:[#allocation2 + $0x49] sm:$0xff] %vm255_vm1, %v1442_v4  ;;  %263 = vst.msk [vmem:[#allocation2 + $0x51] sm:$0xff] %vm255_vm1, %v1442_v4  ;;  %292 = vrot.lane.b32.xlu0 %v270_v7, %s1441_s23  ;;  %294 = vrot.lane.b32.xlu1 %v271_v8, %s1441_s23  ;;  %s1660_s20 = sld [smem:[#allocation7 + $0xd]]  ;;  %v771_v29 = vstv %s1648_s8  ;;  %s1352_s8 = scalar_lea.vmem %s1351_s7, 2048 }
  0x71   : > { %s1662_s26 = sld [smem:[#allocation7 + $0x16]]  ;;  %v944_v30 = vstv %s1650_s5 }
  0x72   : > { %s1664_s28 = sld [smem:[#allocation7 + $0x10]]  ;;  %v381_v31 = vstv %s1652_s10 }
  0x73   : > { %s1666_s23 = sld [smem:[#allocation7 + $0x1f]]  ;;  %v1737_v33 = vstv %s1654_s11 }
  0x74   : > { %s1668_s1 = sld [smem:[#allocation7 + $0x19]]  ;;  %v1740_v34 = vstv %s1656_s27 }
  0x75   : > { %s1670_s0 = sld [smem:[#allocation7 + $0x22]]  ;;  %v1747_v36 = vstv %s1658_s22 }
  0x76   : > { %s1672_s2 = sld [smem:[#allocation7 + $0xe]]  ;;  %v1750_v37 = vstv %s1660_s20 }
  0x77   : > { %s1674_s18 = sld [smem:[#allocation7 + $0x11]]  ;;  %v1753_v38 = vstv %s1662_s26 }
  0x78   : > { %s1676_s16 = sld [smem:[#allocation8]]  ;;  %v1756_v39 = vstv %s1664_s28 }
  0x79   : > { %s1680_s9 = sld [smem:[#allocation7]]  ;;  %v1762_v41 = vstv %s1666_s23 }
  0x7a   : > { %s1682_s14 = sld [smem:[#allocation7 + $0x3]]  ;;  %v1765_v42 = vstv %s1668_s1 }
  0x7b   : > { %s1684_s13 = sld [smem:[#allocation7 + $0x1a]]  ;;  %v1768_v43 = vstv %s1670_s0 }
  0x7c   : > { %s1686_s17 = sld [smem:[#allocation7 + $0x6]]  ;;  %v1773_v44 = vstv %s1672_s2 }
  0x7d   : > { %s1690_s25 = sld [smem:[#allocation7 + $0x23]]  ;;  %v1776_v45 = vstv %s1674_s18 }
  0x7e   : > { %s1693_s12 = sld [smem:[#allocation7 + $0x9]]  ;;  %v315_v46 = vstv %s1676_s16 }
  0x7f   : > { %s1695_s3 = sld [smem:[#allocation7 + $0xc]]  ;;  %v2373_v47 = vstv %s1680_s9 }
  0x80   : > { %s1699_s24 = sld [smem:[#allocation8 + $0x1]]  ;;  %v1787_v50 = vstv %s1682_s14 }
  0x81   : > { %s1704_s15 = sld [smem:[#allocation7 + $0xf]]  ;;  %v1784_v49 = vstv %s1684_s13 }
  0x82   : > { %s1707_s21 = sld [smem:[#allocation7 + $0x15]]  ;;  %v1797_v54 = vstv %s1686_s17 }
  0x83   : > { %s1723_s29 = sld [smem:[#allocation8 + $0x2]]  ;;  %v1794_v53 = vstv %s1690_s25 }
  0x84   : > { %s1731_s6 = sld [smem:[#allocation7 + $0x1e]] }
  0x85   : > { %2407 = sst [smem:[#allocation26_spill]] %s1695_s3 }
  0x86   : > { %2408 = sst [smem:[#allocation27_spill]] %s1699_s24 }
  0x87   : > { %s1710_s3 = sld [smem:[#allocation7 + $0x12]]  ;;  %v1808_v60 = vstv %s1704_s15 }
  0x88   : > { %s1715_s24 = sld [smem:[#allocation7 + $0x18]]  ;;  %v1811_v61 = vstv %s1707_s21 }
  0x89   : > { %s1742_s10 = sld [smem:[#allocation7 + $0x1b]] }
  0x8a   : > { %s1758_s11 = sld [smem:[#allocation7 + $0x21]]  ;;  %v1830_v6 = vstv %s1731_s6 }
  0x8b   : > { %s2409_s27 = sld [smem:[#allocation26_spill]] }
  0x8c   : > { %s1770_s22 = sld [smem:[#allocation8 + $0x3]] }
  0x8d   : > { %s2410_s20 = sld [smem:[#allocation27_spill]] }
  0x8e   : > { %v1819_v2 = vstv %s1715_s24  ;;  %s2159_s0 = sld [smem:[#allocation7 + $0x17]] }
  0x8f   : > { %s1186_s2 = sld [smem:[#allocation7 + $0x20]] }
  0x90   : > { %s2434_s14 = sld [smem:[#allocation18_spill]] }
  0x91   : > { %v1801_v56 = vstv %s2409_s27  ;;  %s2435_s15 = sld [smem:[#allocation21_spill]] }
  0x92   : > { %s2436_s18 = sld [smem:[#allocation32_spill]] }
  0x96   : > { %s1196_s16 = sshll.u32 %s2434_s14, 10 }
  0x97   : > { %p2437_p3 = scmp.ne.s32.totalorder %s2435_s15, 0 }
  0xd6   : > { %v281_v9 = vpop.permute.xlu0 %280  ;;  %v285_v10 = vpop.permute.xlu1 %284 }
  0xd7   : > { %305 = vst.msk [vmem:[#allocation2 + $0x1] sm:$0xff] %vm304_vm3, %v281_v9  ;;  %307 = vst.msk [vmem:[#allocation2 + $0x19] sm:$0xff] %vm304_vm3, %v285_v10  ;;  %v1836_v10 = vstv %s1758_s11 }
  0xda   : > { %v283_v11 = vpop.permute.xlu0 %282  ;;  %v287_v12 = vpop.permute.xlu1 %286 }
  0xdb   : > { %306 = vst.msk [vmem:[#allocation2 + $0x9] sm:$0xff] %vm304_vm3, %v283_v11  ;;  %308 = vst.msk [vmem:[#allocation2 + $0x21] sm:$0xff] %vm304_vm3, %v287_v12 }
  0xde   : > { %v1697_v14 = vld [vmem:[#allocation2] sm:$0xff]  ;;  %v289_v15 = vpop.permute.xlu0 %288  ;;  %v291_v16 = vpop.permute.xlu1 %290  ;;  %v1725_v27 = vld [vmem:[#allocation2 + $0x18] sm:$0xff] }
  0xdf   : > { %v367_v17 = vmul.f32 %v366_v13, %v1697_v14  ;;  %309 = vst.msk [vmem:[#allocation2 + $0x31] sm:$0xff] %vm304_vm3, %v289_v15  ;;  %310 = vst.msk [vmem:[#allocation2 + $0x39] sm:$0xff] %vm304_vm3, %v291_v16  ;;  %v426_v24 = vmul.f32 %v425_v18, %v1697_v14  ;;  %v540_v32 = vmul.f32 %v539_v22, %v1725_v27 }
  0xe0   : > { %v382_v63 = vmul.f32 %v381_v31, %v1697_v14  ;;  %v404_v5 = vmul.f32 %v1737_v33, %v1697_v14  ;;  %v599_v11 = vmul.f32 %v598_v28, %v1725_v27 }
  0xe1   : > { %371 = vrot.lane.b32.xlu0 %v367_v17, %s1443_s19  ;;  %v463_v17 = vmul.f32 %v1747_v36, %v1697_v14 }
  0xe2   : > { %v1712_v19 = vld [vmem:[#allocation2 + $0x8] sm:$0xff]  ;;  %v293_v20 = vpop.permute.xlu0 %292  ;;  %v295_v21 = vpop.permute.xlu1 %294  ;;  %v1789_v51 = vld [vmem:[#allocation2 + $0x20] sm:$0xff]  ;;  %v1804_v58 = vld [vmem:[#allocation2 + $0x10] sm:$0x3] }
  0xe3   : > { %v368_v23 = vmul.f32 %v366_v13, %v1712_v19  ;;  %311 = vst.msk [vmem:[#allocation2 + $0x49] sm:$0xff] %vm304_vm3, %v293_v20  ;;  %312 = vst.msk [vmem:[#allocation2 + $0x51] sm:$0xff] %vm304_vm3, %v295_v21  ;;  %v427_v40 = vmul.f32 %v425_v18, %v1712_v19  ;;  %v541_v57 = vmul.f32 %v539_v22, %v1789_v51 }
  0xe4   : > { %v383_v7 = vmul.f32 %v381_v31, %v1712_v19  ;;  %v384_v8 = vmul.f32 %v381_v31, %v1804_v58  ;;  %v405_v12 = vmul.f32 %v1737_v33, %v1712_v19  ;;  %v441_v13 = vmul.f32 %v1740_v34, %v1697_v14 }
  0xe5   : > { %373 = vrot.lane.b32.xlu1 %v368_v23, %s1443_s19  ;;  %430 = vrot.lane.b32.xlu0 %v426_v24, %s1444_s30  ;;  %v555_v18 = vmul.f32 %v1750_v37, %v1725_v27  ;;  %v1854_v20 = vmul.f32 %v1756_v39, %v1725_v27  ;;  %v1858_v21 = vmul.f32 %v1776_v45, %v1725_v27  ;;  %v388_v23 = vrot.slane %v382_v63, 1 }
  0xe6   : > { %v1744_v35 = vld [vmem:[#allocation2 + $0x30] sm:$0xff]  ;;  %v1813_v62 = vld [vmem:[#allocation2 + $0x38] sm:$0xff]  ;;  %v410_v24 = vrot.slane %v404_v5, 2  ;;  %v389_v31 = vrot.slane %v383_v7, 1  ;;  %v443_v63 = vmul.f32 %v1740_v34, %v1804_v58  ;;  %v465_v5 = vmul.f32 %v1747_v36, %v1804_v58 }
  0xe7   : > { %v713_v48 = vmul.f32 %v712_v25, %v1744_v35  ;;  %v714_v3 = vmul.f32 %v712_v25, %v1813_v62  ;;  %v406_v25 = vmul.f32 %v1737_v33, %v1804_v58  ;;  %v464_v33 = vmul.f32 %v1747_v36, %v1712_v19 }
  0xe8   : > { %v556_v7 = vmul.f32 %v1750_v37, %v1789_v51  ;;  %v390_v36 = vsel %vm335_vm4, %v388_v23, %v389_v31  ;;  %v472_v1 = vrot.slane %v465_v5, 2  ;;  %v561_v23 = vrot.slane %v555_v18, 1 }
  0xe9   : > { %432 = vrot.lane.b32.xlu1 %v427_v40, %s1444_s30  ;;  %544 = vrot.lane.b32.xlu0 %v540_v32, %s1443_s19  ;;  %v391_v32 = vrot.slane %v384_v8, 1  ;;  %v1870_v40 = vmul.f32 %v2373_v47, %v1697_v14  ;;  %v1889_v8 = vld [vmem:[#allocation2 + $0x28] sm:$0x3]  ;;  %v470_v0 = vrot.slane %v464_v33, 2 }
  0xea   : > { %v1791_v52 = vld [vmem:[#allocation2 + $0x48] sm:$0xff]  ;;  %v1846_v16 = vld [vmem:[#allocation2 + $0x50] sm:$0xff]  ;;  %v562_v59 = vrot.slane %v556_v7, 1 }
  0xeb   : > { %v886_v4 = vmul.f32 %v885_v26, %v1791_v52  ;;  %v887_v22 = vmul.f32 %v885_v26, %v1846_v16  ;;  %v442_v26 = vmul.f32 %v1740_v34, %v1712_v19  ;;  %v772_v34 = vmul.f32 %v771_v29, %v1744_v35 }
  0xec   : > { %v1903_v15 = vsel %vm335_vm4, %v389_v31, %v391_v32  ;;  %v1912_v31 = vld [vmem:[#allocation2 + $0x40] sm:$0x3]  ;;  %v324_v47 = vadd.f32 %v1870_v40, %v315_v46  ;;  %v2043_v40 = vmul.f32 %v1765_v42, %v1813_v62 }
  0xed   : > { %546 = vrot.lane.b32.xlu1 %v541_v57, %s1443_s19  ;;  %717 = vrot.lane.b32.xlu0 %v713_v48, %s1443_s19  ;;  %v1874_v48 = vmul.f32 %v1787_v50, %v1697_v14  ;;  %v411_v57 = vrot.slane %v405_v12, 2  ;;  %v773_v12 = vmul.f32 %v771_v29, %v1813_v62  ;;  %v448_v29 = vrot.slane %v442_v26, 1 }
  0xee   : > { %v730_v55 = vmul.f32 %v1753_v38, %v1912_v31  ;;  %v1922_v26 = vmul.f32 %v1762_v41, %v1846_v16 }
  0xef   : > { %v1910_v9 = vsel %vm354_vm5, %v410_v24, %v411_v57  ;;  %v901_v24 = vmul.f32 %v1762_v41, %v1791_v52 }
  0xf1   : > { %719 = vrot.lane.b32.xlu1 %v714_v3, %s1443_s19  ;;  %890 = vrot.lane.b32.xlu0 %v886_v4, %s1443_s19  ;;  %v600_v3 = vmul.f32 %v598_v28, %v1789_v51  ;;  %v447_v4 = vrot.slane %v441_v13, 1  ;;  %v413_v28 = vrot.slane %v406_v25, 2  ;;  %v557_v13 = vmul.f32 %v1750_v37, %v1889_v8 }
  0xf2   : > { %v450_v25 = vrot.slane %v443_v63, 1  ;;  %v469_v37 = vrot.slane %v463_v17, 2  ;;  %v945_v17 = vmul.f32 %v944_v30, %v1791_v52 }
  0xf3   : > { %v564_v32 = vrot.slane %v557_v13, 1  ;;  %v1928_v18 = vsel %vm354_vm5, %v411_v57, %v413_v28  ;;  %v1944_v13 = vsel %vm335_vm4, %v561_v23, %v562_v59  ;;  %v1948_v57 = vmul.f32 %v1776_v45, %v1789_v51 }
  0xf4   : > { %v1935_v5 = vsel %vm335_vm4, %v448_v29, %v450_v25  ;;  %v1938_v7 = vsel %vm354_vm5, %v469_v37, %v470_v0  ;;  %v737_v28 = vrot.slane %v730_v55, 1  ;;  %v1971_v55 = vmul.f32 %v1756_v39, %v1789_v51 }
  0xf5   : > { %892 = vrot.lane.b32.xlu1 %v887_v22, %s1443_s19  ;;  %603 = vrot.lane.b32.xlu0 %v599_v11, %s1444_s30  ;;  %v728_v22 = vmul.f32 %v1753_v38, %v1744_v35  ;;  %v729_v11 = vmul.f32 %v1753_v38, %v1813_v62  ;;  %v449_v38 = vsel %vm335_vm4, %v447_v4, %v448_v29 }
  0xf6   : > { %v1954_v4 = vsel %vm335_vm4, %v562_v59, %v564_v32  ;;  %v1976_v25 = vmul.f32 %v1784_v49, %v1813_v62  ;;  %v982_v37 = vmul.f32 %v1794_v53, %v1791_v52 }
  0xf7   : > { %v734_v63 = vrot.slane %v728_v22, 1  ;;  %v735_v33 = vrot.slane %v729_v11, 1  ;;  %v907_v22 = vrot.slane %v901_v24, 1  ;;  %v1991_v24 = vmul.f32 %v1794_v53, %v1846_v16 }
  0xf9   : > { %605 = vrot.lane.b32.xlu1 %v600_v3, %s1444_s30  ;;  %776 = vrot.lane.b32.xlu0 %v772_v34, %s1444_s30  ;;  %v946_v3 = vmul.f32 %v944_v30, %v1846_v16  ;;  %v1941_v34 = vsel %vm354_vm5, %v470_v0, %v472_v1  ;;  %v642_v30 = vrot.slane %v1858_v21, 2  ;;  %v2372_v0 = vrot.slane %v1922_v26, 1  ;;  %v1957_v1 = vld [vmem:[#allocation2 + $0x58] sm:$0x3]  ;;  %2411 = vst [vmem:[#allocation28_spill] sm:$0xff] %v1991_v24 }
  0xfa   : > { %v1960_v11 = vsel %vm335_vm4, %v734_v63, %v735_v33  ;;  %v1964_v29 = vmul.f32 %v1762_v41, %v1957_v1  ;;  %v2371_v21 = vrot.slane %v1948_v57, 2  ;;  %v1982_v41 = vmul.f32 %v1756_v39, %v1889_v8 }
  0xfb   : > { %v2001_v39 = vsel %vm335_vm4, %v907_v22, %v2372_v0  ;;  %v2375_v63 = vrot.slane %v1976_v25, 2  ;;  %v336_v22 = vrot.slane %v1874_v48, 1 }
  0xfc   : > { %v1987_v23 = vsel %vm354_vm5, %v642_v30, %v2371_v21  ;;  %v988_v30 = vrot.slane %v982_v37, 2  ;;  %v2374_v21 = vrot.slane %v1991_v24, 2  ;;  %v348_v37 = vmul.f32 %v1797_v54, %v1697_v14 }
  0xfd   : > { %778 = vrot.lane.b32.xlu1 %v773_v12, %s1444_s30  ;;  %949 = vrot.lane.b32.xlu0 %v945_v17, %s1444_s30  ;;  %v809_v12 = vmul.f32 %v1784_v49, %v1744_v35  ;;  %v1996_v17 = vsel %vm335_vm4, %v735_v33, %v737_v28  ;;  %v349_v33 = vmul.f32 %v1797_v54, %v1712_v19  ;;  %v2412_v14 = vstv %s1680_s9  ;;  %s2294_s9 = scalar_lea.hbm %s2436_s18, %s1196_s16 }
  0xfe   : > { %v2025_v59 = vsel %vm354_vm5, %v988_v30, %v2374_v21  ;;  %v355_v48 = vrot.slane %v348_v37, 2  ;;  %v331_v30 = vmul.f32 %v1787_v50, %v1804_v58  ;;  %v505_v24 = vmul.f32 %v1801_v56, %v1789_v51 }
  0xff   : > { %v815_v32 = vrot.slane %v809_v12, 2  ;;  %v356_v12 = vrot.slane %v349_v33, 2 }
 0x101   : > { %951 = vrot.lane.b32.xlu1 %v946_v3, %s1444_s30  ;;  %393 = vrot.lane.b32.xlu0 %v390_v36, %s1443_s19  ;;  %v330_v36 = vmul.f32 %v1787_v50, %v1712_v19  ;;  %v2012_v3 = vmul.f32 %v1765_v42, %v1744_v35  ;;  %v2017_v28 = vsel %vm354_vm5, %v815_v32, %v2375_v63 }
 0x102   : > { %v323_v32 = vmul.f32 %v2412_v14, %v1712_v19  ;;  %v357_v19 = vsel %vm354_vm5, %v355_v48, %v356_v12  ;;  %v339_v14 = vrot.slane %v331_v30, 1 }
 0x103   : > { %v337_v0 = vrot.slane %v330_v36, 1  ;;  %v350_v36 = vmul.f32 %v1797_v54, %v1804_v58  ;;  %v2414_v58 = vstv %s2410_s20 }
 0x104   : > { %v325_v50 = vadd.f32 %v323_v32, %v315_v46  ;;  %v522_v32 = vmul.f32 %v1808_v60, %v1725_v27 }
 0x105   : > { %395 = vrot.lane.b32.xlu1 %v1903_v15, %s1443_s19  ;;  %415 = vrot.lane.b32.xlu0 %v1910_v9, %s1443_s19  ;;  %v338_v33 = vsel %vm335_vm4, %v336_v22, %v337_v0  ;;  %v2413_v15 = vstv %s1693_s12  ;;  %v504_v9 = vmul.f32 %v1801_v56, %v1725_v27  ;;  %v358_v54 = vrot.slane %v350_v36, 2 }
 0x106   : > { %v497_v21 = vmul.f32 %v2413_v15, %v1725_v27  ;;  %v343_v37 = vadd.f32 %v338_v33, %v324_v47  ;;  %v584_v47 = vrot.slane %v1971_v55, 2  ;;  %v340_v46 = vsel %vm335_vm4, %v337_v0, %v339_v14 }
 0x107   : > { %v510_v22 = vrot.slane %v504_v9, 1  ;;  %v359_v30 = vsel %vm354_vm5, %v356_v12, %v358_v54  ;;  %v511_v36 = vrot.slane %v505_v24, 1  ;;  %v2415_v33 = vmov %v2413_v15 }
 0x108   : > { %v499_v63 = vadd.f32 %v497_v21, %v2414_v58  ;;  %v2062_v48 = vadd.f32 %v357_v19, %v343_v37  ;;  %v344_v21 = vadd.f32 %v340_v46, %v325_v50  ;;  %v498_v15 = vmul.f32 %v2415_v33, %v1789_v51 }
 0x109   : > { %417 = vrot.lane.b32.xlu1 %v1928_v18, %s1443_s19  ;;  %452 = vrot.lane.b32.xlu0 %v449_v38, %s1444_s30  ;;  %v523_v18 = vmul.f32 %v1808_v60, %v1789_v51  ;;  %v528_v38 = vrot.slane %v522_v32, 2  ;;  %v506_v9 = vmul.f32 %v1801_v56, %v1889_v8  ;;  %v524_v0 = vmul.f32 %v1808_v60, %v1889_v8 }
 0x10a   : > { %v2077_v37 = vadd.f32 %v359_v30, %v344_v21  ;;  %v512_v19 = vsel %vm335_vm4, %v510_v22, %v511_v36  ;;  %v2416_v24 = vstv %s1710_s3  ;;  %v2417_v54 = vmov %v2414_v58  ;;  %s2432_s3 = sld [smem:[#allocation25_spill]] }
 0x10b   : > { %v529_v12 = vrot.slane %v523_v18, 2  ;;  %v670_v50 = vmul.f32 %v2416_v24, %v1744_v35  ;;  %v517_v14 = vadd.f32 %v512_v19, %v499_v63  ;;  %v500_v56 = vadd.f32 %v498_v15, %v2417_v54 }
 0x10c   : > { %v513_v58 = vrot.slane %v506_v9, 1  ;;  %v531_v46 = vrot.slane %v524_v0, 2  ;;  %v2418_v32 = vstv %s1723_s29  ;;  %v677_v21 = vmul.f32 %v1811_v61, %v1744_v35 }
 0x10d   : > { %454 = vrot.lane.b32.xlu1 %v1935_v5, %s1444_s30  ;;  %474 = vrot.lane.b32.xlu0 %v1938_v7, %s1444_s30  ;;  %v530_v60 = vsel %vm354_vm5, %v528_v38, %v529_v12  ;;  %v672_v22 = vadd.f32 %v670_v50, %v2418_v32  ;;  %v678_v30 = vmul.f32 %v1811_v61, %v1813_v62  ;;  %v786_v55 = vstv %s2159_s0 }
 0x10e   : > { %v2096_v5 = vadd.f32 %v530_v60, %v517_v14  ;;  %v514_v7 = vsel %vm335_vm4, %v511_v36, %v513_v58  ;;  %v532_v63 = vsel %vm354_vm5, %v529_v12, %v531_v46  ;;  %v695_v18 = vmul.f32 %v1819_v2, %v1744_v35 }
 0x10f   : > { %v518_v38 = vadd.f32 %v514_v7, %v500_v56  ;;  %v683_v33 = vrot.slane %v677_v21, 1  ;;  %v684_v15 = vrot.slane %v678_v30, 1  ;;  %v696_v9 = vmul.f32 %v1819_v2, %v1813_v62 }
 0x110   : > { %v701_v36 = vrot.slane %v695_v18, 2  ;;  %v2419_v0 = vmov %v2416_v24  ;;  %v679_v12 = vmul.f32 %v1811_v61, %v1912_v31  ;;  %v697_v24 = vmul.f32 %v1819_v2, %v1912_v31  ;;  %s2433_s12 = sshll.u32 %s2432_s3, 6 }
 0x111   : > { %476 = vrot.lane.b32.xlu1 %v1941_v34, %s1444_s30  ;;  %566 = vrot.lane.b32.xlu0 %v1944_v13, %s1443_s19  ;;  %v671_v19 = vmul.f32 %v2419_v0, %v1813_v62  ;;  %v2115_v50 = vadd.f32 %v532_v63, %v518_v38  ;;  %v685_v14 = vsel %vm335_vm4, %v683_v33, %v684_v15  ;;  %v702_v54 = vrot.slane %v696_v9, 2  ;;  %s2269_s13 = scalar_lea.vmem [#allocation10], %s2433_s12 }
 0x112   : > { %v2420_v34 = vstv %s1742_s10  ;;  %v690_v58 = vadd.f32 %v685_v14, %v672_v22  ;;  %v2421_v13 = vmov %v2418_v32  ;;  %v686_v60 = vrot.slane %v679_v12, 1  ;;  %s1023_s17 = sshll.u32 %s2269_s13, 4  ;;  %s2296_s17 = int_to_ptr.vmem [resolvable:$true] %s1023_s17 }
 0x113   : > { %v843_v56 = vmul.f32 %v2420_v34, %v1791_v52  ;;  %v673_v46 = vadd.f32 %v671_v19, %v2421_v13  ;;  %v704_v32 = vrot.slane %v697_v24, 2  ;;  %v703_v21 = vsel %vm354_vm5, %v701_v36, %v702_v54  ;;  %s1346_s1 = scalar_lea.vmem %s2296_s17, 1024  ;;  %p1353_p12 = scmp.lt.s32.totalorder %s2296_s17, %s1351_s7 }
 0x114   : > { %v2422_v61 = vstv %s1770_s22  ;;  %v850_v2 = vmul.f32 %v1830_v6, %v1791_v52  ;;  %v851_v7 = vmul.f32 %v1830_v6, %v1846_v16  ;;  %v586_v22 = vrot.slane %v1982_v41, 2  ;;  %p1347_p7 = scmp.ne.s32.totalorder %s2296_s17, %s1346_s1  ;;  %p1354_p13 = scmp.lt.s32.totalorder %s1352_s8, %s1346_s1 }
 0x115   : > { %v845_v30 = vadd.f32 %v843_v56, %v2422_v61  ;;  %568 = vrot.lane.b32.xlu1 %v1954_v4, %s1443_s19  ;;  %739 = vrot.lane.b32.xlu0 %v1960_v11, %s1443_s19  ;;  %v2135_v63 = vadd.f32 %v703_v21, %v690_v58  ;;  %v687_v18 = vsel %vm335_vm4, %v684_v15, %v686_v60  ;;  %v2426_v13 = vrot.slane %v1922_v26, 1 }
 0x116   : > { %v705_v38 = vsel %vm354_vm5, %v702_v54, %v704_v32  ;;  %v691_v33 = vadd.f32 %v687_v18, %v673_v46  ;;  %v856_v9 = vrot.slane %v850_v2, 1  ;;  %v857_v36 = vrot.slane %v851_v7, 1  ;;  %p1348_p8 = pnand %p1347_p7, %p2437_p3  ;;  %p1355_p2 = por %p1354_p13, %p1353_p12 }
 0x117   : > { %v868_v0 = vmul.f32 %v1836_v10, %v1791_v52  ;;  %v869_v4 = vmul.f32 %v1836_v10, %v1846_v16  ;;  %v2423_v11 = vmov %v2420_v34  ;;  %v852_v41 = vmul.f32 %v1830_v6, %v1957_v1 }
 0x118   : > { %v844_v19 = vmul.f32 %v2423_v11, %v1846_v16  ;;  %v870_v15 = vmul.f32 %v1836_v10, %v1957_v1  ;;  %v752_v12 = vmul.f32 %v1765_v42, %v1912_v31  ;;  %v2152_v24 = vadd.f32 %v705_v38, %v691_v33  ;;  %p1349_p9 = pneg %p1348_p8 }
 0x119   : > { %v858_v14 = vsel %vm335_vm4, %v856_v9, %v857_v36  ;;  %v874_v54 = vrot.slane %v868_v0, 2  ;;  %741 = vrot.lane.b32.xlu1 %v1996_v17, %s1443_s19  ;;  %912 = vrot.lane.b32.xlu0 %v2001_v39, %s1443_s19  ;;  %v875_v34 = vrot.slane %v869_v4, 2  ;;  %v2424_v56 = vmov %v2422_v61 }
 0x11a   : > { %v863_v6 = vadd.f32 %v858_v14, %v845_v30  ;;  %v846_v10 = vadd.f32 %v844_v19, %v2424_v56  ;;  %v859_v58 = vrot.slane %v852_v41, 1  ;;  %v2425_v42 = vrot.slane %v1964_v29, 1  ;;  %p1356_p4 = pnand %p1355_p2, %p1349_p9 }
 0x11b   : > { %v756_v60 = vrot.slane %v2012_v3, 2  ;;  %v923_v17 = vmul.f32 %v1768_v43, %v1791_v52  ;;  %v877_v39 = vrot.slane %v870_v15, 2  ;;  %v2427_v32 = vrot.slane %v1854_v20, 2 }
 0x11c   : > { %v911_v46 = vsel %vm335_vm4, %v2426_v13, %v2425_v42  ;;  %v924_v29 = vmul.f32 %v1768_v43, %v1846_v16  ;;  %v876_v26 = vsel %vm354_vm5, %v874_v54, %v875_v34  ;;  %v860_v61 = vsel %vm335_vm4, %v857_v36, %v859_v58 }
 0x11d   : > { %v585_v21 = vsel %vm354_vm5, %v2427_v32, %v584_v47  ;;  %v757_v3 = vrot.slane %v2043_v40, 2  ;;  %v2181_v30 = vadd.f32 %v876_v26, %v863_v6  ;;  %v864_v2 = vadd.f32 %v860_v61, %v846_v10  ;;  %914 = vrot.lane.b32.xlu1 %v911_v46, %s1443_s19 }
 0x11e   : > { %v878_v7 = vsel %vm354_vm5, %v875_v34, %v877_v39  ;;  %588 = vrot.lane.b32.xlu0 %v585_v21, %s1443_s19  ;;  %v587_v18 = vsel %vm354_vm5, %v584_v47, %v586_v22  ;;  %v759_v38 = vrot.slane %v752_v12, 2  ;;  %v925_v40 = vmul.f32 %v1768_v43, %v1957_v1 }
 0x11f   : > { %v2186_v20 = vadd.f32 %v878_v7, %v864_v2  ;;  %v614_v33 = vmul.f32 %v1773_v44, %v1725_v27  ;;  %v758_v9 = vsel %vm354_vm5, %v756_v60, %v757_v3  ;;  %v929_v36 = vrot.slane %v923_v17, 2 }
 0x120   : > { %v930_v0 = vrot.slane %v924_v29, 2  ;;  %v615_v4 = vmul.f32 %v1773_v44, %v1789_v51  ;;  %v959_v47 = vstv %s1186_s2  ;;  %v760_v22 = vsel %vm354_vm5, %v757_v3, %v759_v38 }
 0x121   : > { %590 = vrot.lane.b32.xlu1 %v587_v18, %s1443_s19  ;;  %v932_v11 = vrot.slane %v925_v40, 2  ;;  %v620_v43 = vrot.slane %v614_v33, 1  ;;  %v616_v27 = vmul.f32 %v1773_v44, %v1889_v8  ;;  %v787_v15 = vmul.f32 %v786_v55, %v1744_v35 }
 0x122   : > { %761 = vrot.lane.b32.xlu0 %v758_v9, %s1443_s19  ;;  %v931_v19 = vsel %vm354_vm5, %v929_v36, %v930_v0  ;;  %v621_v41 = vrot.slane %v615_v4, 1  ;;  %v788_v51 = vmul.f32 %v786_v55, %v1813_v62  ;;  %v789_v54 = vmul.f32 %v786_v55, %v1912_v31 }
 0x123   : > { %v933_v12 = vsel %vm354_vm5, %v930_v0, %v932_v11  ;;  %v623_v14 = vrot.slane %v616_v27, 1  ;;  %v960_v6 = vmul.f32 %v959_v47, %v1791_v52  ;;  %v793_v34 = vrot.slane %v787_v15, 1 }
 0x124   : > { %v622_v44 = vsel %vm335_vm4, %v620_v43, %v621_v41  ;;  %v794_v56 = vrot.slane %v788_v51, 1  ;;  %v961_v10 = vmul.f32 %v959_v47, %v1846_v16  ;;  %v796_v62 = vrot.slane %v789_v54, 1 }
 0x125   : > { %763 = vrot.lane.b32.xlu1 %v760_v22, %s1443_s19  ;;  %v624_v35 = vsel %vm335_vm4, %v621_v41, %v623_v14  ;;  %v966_v42 = vrot.slane %v960_v6, 1  ;;  %v962_v46 = vmul.f32 %v959_v47, %v1957_v1  ;;  %v638_v17 = vmul.f32 %v1776_v45, %v1889_v8 }
 0x126   : > { %934 = vrot.lane.b32.xlu0 %v931_v19, %s1443_s19  ;;  %v795_v58 = vsel %vm335_vm4, %v793_v34, %v794_v56  ;;  %v967_v13 = vrot.slane %v961_v10, 1  ;;  %v797_v52 = vsel %vm335_vm4, %v794_v56, %v796_v62  ;;  %v811_v21 = vmul.f32 %v1784_v49, %v1912_v31 }
 0x127   : > { %v969_v60 = vrot.slane %v962_v46, 1  ;;  %v645_v32 = vrot.slane %v638_v17, 2  ;;  %v2428_v29 = vrot.slane %v1948_v57, 2  ;;  %v984_v8 = vmul.f32 %v1794_v53, %v1957_v1  ;;  %v2430_v57 = vld [vmem:[#allocation28_spill] sm:$0xff] }
 0x128   : > { %v968_v16 = vsel %vm335_vm4, %v966_v42, %v967_v13  ;;  %v818_v45 = vrot.slane %v811_v21, 2  ;;  %v2429_v49 = vrot.slane %v1976_v25, 2 }
 0x129   : > { %936 = vrot.lane.b32.xlu1 %v933_v12, %s1443_s19  ;;  %v970_v39 = vsel %vm335_vm4, %v967_v13, %v969_v60  ;;  %v646_v26 = vsel %vm354_vm5, %v2428_v29, %v645_v32  ;;  %v991_v61 = vrot.slane %v984_v8, 2  ;;  %s1007_s19 = scalar_lea.sflag [#allocation5], %s2432_s3 }
 0x12a   : > { %625 = vrot.lane.b32.xlu0 %v622_v44, %s1444_s30  ;;  %v819_v31 = vsel %vm354_vm5, %v2429_v49, %v818_v45 }
 0x12d   : > { %627 = vrot.lane.b32.xlu1 %v624_v35, %s1444_s30 }
 0x12e   : > { %798 = vrot.lane.b32.xlu0 %v795_v58, %s1444_s30 }
 0x131   : > { %800 = vrot.lane.b32.xlu1 %v797_v52, %s1444_s30 }
 0x132   : > { %971 = vrot.lane.b32.xlu0 %v968_v16, %s1444_s30 }
 0x135   : > { %973 = vrot.lane.b32.xlu1 %v970_v39, %s1444_s30 }
 0x136   : > { %647 = vrot.lane.b32.xlu0 %v1987_v23, %s1444_s30  ;;  %v2431_v23 = vrot.slane %v2430_v57, 2 }
 0x138   : > { %v992_v3 = vsel %vm354_vm5, %v2431_v23, %v991_v61 }
 0x139   : > { %649 = vrot.lane.b32.xlu1 %v646_v26, %s1444_s30 }
 0x13a   : > { %820 = vrot.lane.b32.xlu0 %v2017_v28, %s1444_s30 }
 0x13d   : > { %822 = vrot.lane.b32.xlu1 %v819_v31, %s1444_s30 }
 0x13e   : > { %993 = vrot.lane.b32.xlu0 %v2025_v59, %s1444_s30 }
 0x141   : > { %995 = vrot.lane.b32.xlu1 %v992_v3, %s1444_s30 }
 0x153   : > { %v372_v53 = vpop.permute.xlu0 %371 }
 0x154   : > { %v377_v27 = vadd.f32 %v372_v53, %v2062_v48 }
 0x157   : > { %v374_v1 = vpop.permute.xlu1 %373  ;;  %v431_v2 = vpop.permute.xlu0 %430 }
 0x15b   : > { %v433_v28 = vpop.permute.xlu1 %432  ;;  %v545_v7 = vpop.permute.xlu0 %544 }
 0x15c   : > { %v550_v25 = vadd.f32 %v545_v7, %v2096_v5 }
 0x15f   : > { %v547_v18 = vpop.permute.xlu1 %546  ;;  %v718_v38 = vpop.permute.xlu0 %717 }
 0x160   : > { %v551_v40 = vadd.f32 %v547_v18, %v2115_v50  ;;  %v723_v33 = vadd.f32 %v718_v38, %v2135_v63 }
 0x163   : > { %v720_v59 = vpop.permute.xlu1 %719  ;;  %v891_v9 = vpop.permute.xlu0 %890 }
 0x164   : > { %v724_v36 = vadd.f32 %v720_v59, %v2152_v24  ;;  %v896_v0 = vadd.f32 %v891_v9, %v2181_v30  ;;  %v378_v30 = vadd.f32 %v374_v1, %v2077_v37 }
 0x167   : > { %v893_v4 = vpop.permute.xlu1 %892  ;;  %v604_v55 = vpop.permute.xlu0 %603 }
 0x168   : > { %v2257_v47 = vadd.f32 %v893_v4, %v2186_v20 }
 0x16b   : > { %v606_v22 = vpop.permute.xlu1 %605  ;;  %v777_v11 = vpop.permute.xlu0 %776 }
 0x16f   : > { %v2259_v5 = vpop.permute.xlu1 %778  ;;  %v2261_v43 = vpop.permute.xlu0 %949 }
 0x173   : > { %v2263_v50 = vpop.permute.xlu1 %951  ;;  %v394_v63 = vpop.permute.xlu0 %393 }
 0x174   : > { %v399_v19 = vadd.f32 %v394_v63, %v377_v27 }
 0x177   : > { %v396_v24 = vpop.permute.xlu1 %395  ;;  %v416_v41 = vpop.permute.xlu0 %415 }
 0x178   : > { %v421_v15 = vadd.f32 %v416_v41, %v399_v19  ;;  %v400_v20 = vadd.f32 %v396_v24, %v378_v30 }
 0x17a   : > { %v436_v51 = vadd.f32 %v431_v2, %v421_v15 }
 0x17b   : > { %v418_v12 = vpop.permute.xlu1 %417  ;;  %v453_v14 = vpop.permute.xlu0 %452 }
 0x17c   : > { %v422_v54 = vadd.f32 %v418_v12, %v400_v20  ;;  %v458_v6 = vadd.f32 %v453_v14, %v436_v51 }
 0x17e   : > { %v437_v44 = vadd.f32 %v433_v28, %v422_v54 }
 0x17f   : > { %v455_v34 = vpop.permute.xlu1 %454  ;;  %v475_v56 = vpop.permute.xlu0 %474 }
 0x180   : > { %v480_v10 = vadd.f32 %v475_v56, %v458_v6  ;;  %v459_v35 = vadd.f32 %v455_v34, %v437_v44 }
 0x182   : > { %v482_v48 = vmax.f32 %v480_v10, 0.0 }
 0x183   : > { %v477_v62 = vpop.permute.xlu1 %476  ;;  %v567_v58 = vpop.permute.xlu0 %566 }
 0x184   : > { %485 = vst.msk [vmem:[%s2269_s13] sm:$0xff] %vm484_vm6, %v482_v48  ;;  %v481_v37 = vadd.f32 %v477_v62, %v459_v35  ;;  %v572_v8 = vadd.f32 %v567_v58, %v550_v25 }
 0x186   : > { %v483_v42 = vmax.f32 %v481_v37, 0.0 }
 0x187   : > { %v569_v13 = vpop.permute.xlu1 %568  ;;  %v740_v46 = vpop.permute.xlu0 %739 }
 0x188   : > { %486 = vst.msk [vmem:[%s2269_s13 + $0x8] sm:$0xff] %vm484_vm6, %v483_v42  ;;  %v573_v57 = vadd.f32 %v569_v13, %v551_v40  ;;  %v745_v23 = vadd.f32 %v740_v46, %v723_v33 }
 0x18b   : > { %v742_v52 = vpop.permute.xlu1 %741  ;;  %v913_v16 = vpop.permute.xlu0 %912 }
 0x18c   : > { %v746_v7 = vadd.f32 %v742_v52, %v724_v36  ;;  %v918_v18 = vadd.f32 %v913_v16, %v896_v0 }
 0x18f   : > { %v915_v60 = vpop.permute.xlu1 %914 }
 0x190   : > { %v589_v17 = vpop.permute.xlu0 %588  ;;  %v919_v24 = vadd.f32 %v915_v60, %v2257_v47 }
 0x191   : > { %v594_v61 = vadd.f32 %v589_v17, %v572_v8 }
 0x193   : > { %v591_v39 = vpop.permute.xlu1 %590  ;;  %v609_v28 = vadd.f32 %v604_v55, %v594_v61 }
 0x194   : > { %v762_v32 = vpop.permute.xlu0 %761  ;;  %v595_v1 = vadd.f32 %v591_v39, %v573_v57 }
 0x195   : > { %v767_v2 = vadd.f32 %v762_v32, %v745_v23 }
 0x196   : > { %v610_v27 = vadd.f32 %v606_v22, %v595_v1 }
 0x197   : > { %v764_v21 = vpop.permute.xlu1 %763  ;;  %v782_v25 = vadd.f32 %v777_v11, %v767_v2 }
 0x198   : > { %v935_v29 = vpop.permute.xlu0 %934  ;;  %v768_v59 = vadd.f32 %v764_v21, %v746_v7 }
 0x199   : > { %v940_v63 = vadd.f32 %v935_v29, %v918_v18 }
 0x19a   : > { %v783_v30 = vadd.f32 %v2259_v5, %v768_v59 }
 0x19b   : > { %v937_v26 = vpop.permute.xlu1 %936  ;;  %v955_v15 = vadd.f32 %v2261_v43, %v940_v63 }
 0x19c   : > { %v626_v45 = vpop.permute.xlu0 %625  ;;  %v941_v55 = vadd.f32 %v937_v26, %v919_v24 }
 0x19d   : > { %v631_v38 = vadd.f32 %v626_v45, %v609_v28 }
 0x19e   : > { %v956_v54 = vadd.f32 %v2263_v50, %v941_v55 }
 0x19f   : > { %v628_v49 = vpop.permute.xlu1 %627 }
 0x1a0   : > { %v799_v31 = vpop.permute.xlu0 %798  ;;  %v632_v40 = vadd.f32 %v628_v49, %v610_v27 }
 0x1a1   : > { %v804_v33 = vadd.f32 %v799_v31, %v782_v25 }
 0x1a3   : > { %v801_v3 = vpop.permute.xlu1 %800 }
 0x1a4   : > { %v972_v53 = vpop.permute.xlu0 %971  ;;  %v805_v11 = vadd.f32 %v801_v3, %v783_v30 }
 0x1a5   : > { %v977_v47 = vadd.f32 %v972_v53, %v955_v15 }
 0x1a7   : > { %v974_v9 = vpop.permute.xlu1 %973 }
 0x1a8   : > { %v648_v4 = vpop.permute.xlu0 %647  ;;  %v978_v44 = vadd.f32 %v974_v9, %v956_v54 }
 0x1a9   : > { %v653_v19 = vadd.f32 %v648_v4, %v631_v38 }
 0x1ab   : > { %v655_v41 = vmax.f32 %v653_v19, 0.0  ;;  %v650_v36 = vpop.permute.xlu1 %649 }
 0x1ac   : > { %v821_v0 = vpop.permute.xlu0 %820  ;;  %v654_v20 = vadd.f32 %v650_v36, %v632_v40 }
 0x1ad   : > { %1164 = vst.msk [vmem:[%s2269_s13 + $0x10] sm:$0xff] %vm484_vm6, %v655_v41  ;;  %v826_v22 = vadd.f32 %v821_v0, %v804_v33 }
 0x1ae   : > { %v656_v51 = vmax.f32 %v654_v20, 0.0 }
 0x1af   : > { %v828_v12 = vmax.f32 %v826_v22, 0.0  ;;  %v823_v14 = vpop.permute.xlu1 %822 }
 0x1b0   : > { %v994_v5 = vpop.permute.xlu0 %993  ;;  %1165 = vst.msk [vmem:[%s2269_s13 + $0x18] sm:$0xff] %vm484_vm6, %v656_v51  ;;  %v827_v43 = vadd.f32 %v823_v14, %v805_v11 }
 0x1b1   : > { %1176 = vst.msk [vmem:[%s2269_s13 + $0x20] sm:$0xff] %vm484_vm6, %v828_v12  ;;  %v999_v6 = vadd.f32 %v994_v5, %v977_v47 }
 0x1b2   : > { %v829_v34 = vmax.f32 %v827_v43, 0.0 }
 0x1b3   : > { %v1001_v56 = vmax.f32 %v999_v6, 0.0  ;;  %v996_v10 = vpop.permute.xlu1 %995 }
 0x1b4   : > { %1177 = vst.msk [vmem:[%s2269_s13 + $0x28] sm:$0xff] %vm484_vm6, %v829_v34  ;;  %v1000_v50 = vadd.f32 %v996_v10, %v978_v44 }
 0x1b5   : > { %1188 = vst.msk [vmem:[%s2269_s13 + $0x30] sm:$0xff] %vm484_vm6, %v1001_v56 }
 0x1b6   : > { %v1002_v35 = vmax.f32 %v1000_v50, 0.0 }
 0x1b8   : > { %1189 = vst.msk [vmem:[%s2269_s13 + $0x38] sm:$0xff] %vm484_vm6, %v1002_v35 }
 0x1b9   : > { %1359 = shalt.err (!%p1356_p4)
}
 0x1ba   : > { %s1360_s5 = scalar_lea.hbm %s2294_s9, 1024  ;;  %s1364_s23 = scalar_lea.hbm %s2436_s18, 2048 }
 0x1bb   : > { %p1361_p10 = scmp.ne.s32.totalorder %s2294_s9, %s1360_s5  ;;  %p1365_p1 = scmp.lt.s32.totalorder %s2294_s9, %s2436_s18 }
 0x1bc   : > { %p1366_p6 = scmp.lt.s32.totalorder %s1364_s23, %s1360_s5 }
 0x1bd   : > { %p1362_p5 = pnand %p1361_p10, %p2437_p3 }
 0x1be   : > { %p1367_p11 = por %p1366_p6, %p1365_p1 }
 0x1bf   : > { %p1363_p0 = pneg %p1362_p5 }
 0x1c1   : > { %p1368_p7 = pnand %p1367_p11, %p1363_p0 }
 0x1c3   : > { %1371 = shalt.err (!%p1368_p7)
}
 0x1c4   : > { %s1446_s6 = smov 128   ;;  %s1447_s30 = smov 8  }
 0x1c5   : > { %1207 = dma.vmem_to_hbm [thread:$0]  (%p2437_p3), %s2296_s17, 1024, %s2294_s9, %s1007_s19, %s1446_s6, %s1446_s6, %s1447_s30  }
 0x1c6 PF: > { %s2438_s10 = sld [smem:[#allocation15_spill]] }
 0x1c7   : > { %s2439_s11 = sld [smem:[#allocation22_spill]] }
 0x1c8   : > { %s2440_s27 = sld [smem:[#allocation20_spill]] }
 0x1cc   : > { %s1038_s22 = sand.u32 1, %s2438_s10  }
 0x1cd   : > { %p2441_p8 = scmp.ne.s32.totalorder %s2439_s11, 0  ;;  %s1039_s20 = scalar_lea.sflag [#allocation5], %s1038_s22 }
 0x1ce   : > { %p2442_p9 = scmp.ge.s32.totalorder %s2440_s27, 2 }
 0x1d0   : > { %p1221_p12 = pnand %p2442_p9, %p2441_p8 }
 0x1d2   : > { %p1222_p13 = pneg %p1221_p12 }
 0x1d4   : > { %1409 = dma.done.wait (%p1222_p13), %s1039_s20, 1024  }
 0x1d5   : > { %1411 = vsyncadd (%p1222_p13), %s1039_s20, 4294966272  ;;  %s21_s17 = sadd.s32 1, %s2440_s27   ;;  %s2443_s12 = sld [smem:[#allocation16_spill]] }
 0x1d6   : > { %p18_p2 = scmp.ge.s32.totalorder %s21_s17, 4   ;;  %s2444_s13 = sld [smem:[#allocation17_spill]] }
 0x1d7   : > { %s2445_s14 = sld [smem:[#allocation24_spill]] }
 0x1d8   : > { %s2446_s15 = sld [smem:[#allocation19_spill]]  ;;  %20 = sbr.rel (!%p18_p2) target bundleno = 13 (0xd), region = 92 }
 0x1d9   : > { %s2447_s16 = sld [smem:[#allocation23_spill]] }
 0x1dd   :  { %1044 = vsyncpa [#allocation4], 1 }
 0x1de   :  { %1046 = vsyncpa [#allocation4 + $0x1], 1 }
 0x1df   :  { %1047 = vsyncpa [#allocation5], 1 }
 0x1e0   :  { %1049 = vsyncpa [#allocation5 + $0x1], 1 }
 0x1e1   :  { %1050 = vsyncpa [#allocation6], 1 }
 0x1e2   :  { %1052 = vsyncpa [#allocation6 + $0x1], 1 }
 0x1e3   :  { %1053 = vsyncpa [#allocation9], 1 }

</bundles_post_ra>
